<compile_context>
chip_gen: v5e
topology: v5e:2x2
jax: 0.10.0
libtpu: 0.0.40
codegen_flags: <defaults>
</compile_context>

<pallas_src>
import functools

import jax
import jax.numpy as jnp
from jax.experimental import pallas as pl
from jax.experimental.pallas import tpu as pltpu

EPS = 1e-5  # torch.nn.LayerNorm default


# ---------------------------------------------------------------------------
# in-kernel helpers (pure elementwise / reduction math, VPU/EUP friendly)
# ---------------------------------------------------------------------------
def _layernorm_2d(x, g, b):
  """LayerNorm over last dim.  x: (M, C); g, b: (1, C)."""
  mu = jnp.mean(x, axis=-1, keepdims=True)
  var = jnp.mean((x - mu) ** 2, axis=-1, keepdims=True)
  return (x - mu) * jax.lax.rsqrt(var + EPS) * g + b


def _erf(x, recip=None):
  """float32 rational-polynomial erf (Eigen/XLA style), |x| clamped to 4."""
  x = jnp.clip(x, -4.0, 4.0)
  x2 = x * x
  p = jnp.float32(-2.72614225801306e-10)
  p = p * x2 + jnp.float32(2.77068142495902e-08)
  p = p * x2 + jnp.float32(-2.10102402082508e-06)
  p = p * x2 + jnp.float32(-5.69250639462346e-05)
  p = p * x2 + jnp.float32(-7.34990630326855e-04)
  p = p * x2 + jnp.float32(-2.95459980854025e-03)
  p = p * x2 + jnp.float32(-1.60960333262415e-02)
  p = x * p
  q = jnp.float32(-1.45660718464996e-05)
  q = q * x2 + jnp.float32(-2.13374055278905e-04)
  q = q * x2 + jnp.float32(-1.68282697438203e-03)
  q = q * x2 + jnp.float32(-7.37332916720468e-03)
  q = q * x2 + jnp.float32(-1.42647390514189e-02)
  if recip is None:            # host / plain-JAX reference path
    return p / q
  return p * recip(q)          # in-kernel path: EUP reciprocal, VALU stays free


def _gelu_exact(x, recip=None):
  # torch.nn.GELU default: 0.5 * x * (1 + erf(x / sqrt(2)))
  return 0.5 * x * (1.0 + _erf(x * jnp.float32(0.7071067811865476), recip=recip))


# ---------------------------------------------------------------------------
# fused kernel: one grid step == one (batch element, layer) pair
# ---------------------------------------------------------------------------
def encoder_kernel(x_ref, ln1g_ref, ln1b_ref, wqkv_ref, wproj_ref, bproj_ref,
                   ln2g_ref, ln2b_ref, w1_ref, b1_ref, w2_ref, b2_ref,
                   lnfg_ref, lnfb_ref, o_ref,
                   xs_ref, qh_ref, kh_ref, vh_ref, ctx_ref, *, num_heads):
  l = pl.program_id(1)
  N, C = x_ref.shape
  H = num_heads
  hd = C // H
  bf16 = jnp.bfloat16

  # Layer 0 of each batch element: load the residual stream into VMEM scratch.
  @pl.when(l == 0)
  def _():
    xs_ref[...] = x_ref[...]

  x = xs_ref[...]                                          # (N, C) f32

  # ----- attention block -----
  h = _layernorm_2d(x, ln1g_ref[...], ln1b_ref[...])
  # Q columns of wqkv are pre-scaled by 1/sqrt(hd) host-side; weights are bf16.
  qkv = jnp.dot(h.astype(bf16), wqkv_ref[...],
                preferred_element_type=jnp.float32)        # (N, 3C) f32
  qkv = qkv.astype(bf16)                                   # single cast

  # Scatter per-head lane slices into head-major (H, N, hd) bf16 scratch.
  # This is the one unavoidable lane realignment, done once in bf16 via VMEM
  # (no f32 copies, no in-register stack).
  for hh in range(H):
    qh_ref[hh, :, :] = qkv[:, hh * hd:(hh + 1) * hd]
    kh_ref[hh, :, :] = qkv[:, C + hh * hd:C + (hh + 1) * hd]
    vh_ref[hh, :, :] = qkv[:, 2 * C + hh * hd:2 * C + (hh + 1) * hd]
  q = qh_ref[...]                                          # (H, N, hd) bf16
  k = kh_ref[...]
  v = vh_ref[...]

  s = jnp.einsum('hqd,hkd->hqk', q, k,
                 preferred_element_type=jnp.float32)       # (H, N, N) f32
  s = s - jnp.max(s, axis=-1, keepdims=True)
  p = jnp.exp(s)
  p = p * pl.reciprocal(jnp.sum(p, axis=-1, keepdims=True), approx=True)
  # attn_drop is identity in eval mode.
  ctx = jnp.einsum('hqk,hkd->hqd', p.astype(bf16), v,
                   preferred_element_type=jnp.float32)     # (H, N, hd) f32

  # Gather heads back to lanes: (H, N, hd) -> (N, C) bf16 scratch, then the
  # output projection is ONE K=C contraction on the MXU.
  ctx = ctx.astype(bf16)
  for hh in range(H):
    ctx_ref[:, hh * hd:(hh + 1) * hd] = ctx[hh]
  proj = jnp.dot(ctx_ref[...], wproj_ref[...],
                 preferred_element_type=jnp.float32)       # (N, C) f32
  # proj_drop is identity in eval mode.
  x = x + proj + bproj_ref[...]

  # ----- MLP block -----
  h2 = _layernorm_2d(x, ln2g_ref[...], ln2b_ref[...])
  m = jnp.dot(h2.astype(bf16), w1_ref[...],
              preferred_element_type=jnp.float32) + b1_ref[...]
  m = _gelu_exact(m, recip=lambda z: pl.reciprocal(z, approx=False))
  m = jnp.dot(m.astype(bf16), w2_ref[...],
              preferred_element_type=jnp.float32) + b2_ref[...]
  x = x + m

  xs_ref[...] = x                                          # carry residual in VMEM

  # Last layer: fused final LayerNorm epilogue + output writeback.
  @pl.when(l == pl.num_programs(1) - 1)
  def _():
    o_ref[...] = _layernorm_2d(x, lnfg_ref[...], lnfb_ref[...])


# ---------------------------------------------------------------------------
# pallas_call wrapper
# ---------------------------------------------------------------------------
def _vmem_limit_bytes(N, C, hidden, H):
  w_layer = 2 * (3 * C * C + C * C + C * hidden + hidden * C)     # bf16 weights
  p_layer = 4 * (6 * C + hidden)                                  # f32 LN/bias
  resident = 2 * (w_layer + p_layer)                              # double-buffered
  io = 2 * 2 * (N * C * 4)                                        # x in + out blocks
  scratch = 4 * N * C + 3 * 2 * N * C + 2 * N * C
  acts = 4 * (3 * N * C + 2 * H * N * N + N * hidden + 6 * N * C)
  est = resident + io + scratch + 2 * acts + (8 << 20)
  try:
    cap = int(pltpu.get_tpu_info().vmem_capacity_bytes)           # per-chip (v5e/v6e/v7x)
  except Exception:  # pragma: no cover - e.g. interpret mode
    cap = 64 << 20
  return int(max(32 << 20, min(est, int(0.85 * cap))))


@functools.partial(jax.jit, static_argnames=('num_heads',))
def transformer_encoder_forward(x, params, *, num_heads):
  """x: (B, N, C) f32; params: output of prepare_encoder_params (stacked)."""
  B, N, C = x.shape
  depth = params['wqkv'].shape[0]
  hidden = params['w1'].shape[-1]
  H = num_heads
  hd = C // H

  args = (x, params['ln1_g'], params['ln1_b'], params['wqkv'], params['wproj'],
          params['bproj'], params['ln2_g'], params['ln2_b'], params['w1'],
          params['b1'], params['w2'], params['b2'],
          params['lnf_g'], params['lnf_b'])

  def layer_spec(a):  # stacked (depth, ...) param: select layer l, stay resident per step
    nd = a.ndim - 1
    return pl.BlockSpec((None,) + tuple(a.shape[1:]),
                        lambda b, l, _nd=nd: (l,) + (0,) * _nd)

  def const_spec(a):  # final-LN params: constant across the whole grid
    nd = a.ndim
    return pl.BlockSpec(tuple(a.shape), lambda b, l, _nd=nd: (0,) * _nd)

  x_spec = pl.BlockSpec((None, N, C), lambda b, l: (b, 0, 0))
  in_specs = ([x_spec]
              + [layer_spec(a) for a in args[1:12]]
              + [const_spec(args[12]), const_spec(args[13])])

  kernel = functools.partial(encoder_kernel, num_heads=num_heads)
  # TODO(synk): for large B (or B < number of TensorCores on v7x) add a batch /
  # query-tile blocking dimension to raise MXU row-fill and feed both cores.
  return pl.pallas_call(
      kernel,
      out_shape=jax.ShapeDtypeStruct((B, N, C), jnp.float32),
      grid=(B, depth),
      in_specs=in_specs,
      out_specs=pl.BlockSpec((None, N, C), lambda b, l: (b, 0, 0)),
      scratch_shapes=[
          pltpu.VMEM((N, C), jnp.float32),        # residual stream across layers
          pltpu.VMEM((H, N, hd), jnp.bfloat16),   # Q head-major
          pltpu.VMEM((H, N, hd), jnp.bfloat16),   # K head-major
          pltpu.VMEM((H, N, hd), jnp.bfloat16),   # V head-major
          pltpu.VMEM((N, C), jnp.bfloat16),       # context, lane-major for proj
      ],
      compiler_params=pltpu.CompilerParams(
          dimension_semantics=("parallel", "arbitrary"),
          vmem_limit_bytes=_vmem_limit_bytes(N, C, hidden, H)),
  )(*args)


def prepare_encoder_params(layer_params, final_params, num_heads):
  """One-time host-side prep (call at weight-load time, OUTSIDE jit):
  fold 1/sqrt(hd) into Q columns, cast matmul weights to bf16, stack all
  per-layer params along a leading depth axis."""
  C = layer_params[0]['wqkv'].shape[0]
  hd = C // num_heads
  scale = hd ** -0.5

  def stack(fn):
    return jnp.stack([fn(p) for p in layer_params], axis=0)

  return dict(
      ln1_g=stack(lambda p: p['ln1_g']),
      ln1_b=stack(lambda p: p['ln1_b']),
      wqkv=stack(lambda p: p['wqkv'].at[:, :C].multiply(scale)
                 .astype(jnp.bfloat16)),
      wproj=stack(lambda p: p['wproj'].astype(jnp.bfloat16)),
      bproj=stack(lambda p: p['bproj']),
      ln2_g=stack(lambda p: p['ln2_g']),
      ln2_b=stack(lambda p: p['ln2_b']),
      w1=stack(lambda p: p['w1'].astype(jnp.bfloat16)),
      b1=stack(lambda p: p['b1']),
      w2=stack(lambda p: p['w2'].astype(jnp.bfloat16)),
      b2=stack(lambda p: p['b2']),
      lnf_g=final_params['g'],
      lnf_b=final_params['b'],
  )


# ---------------------------------------------------------------------------
# deterministic parameter init (shapes from the PyTorch __init__)
# ---------------------------------------------------------------------------
def init_params(key, embed_dim, depth, mlp_ratio):
  hidden = int(embed_dim * mlp_ratio)
  layers = []
  for d in range(depth):
    ks = jax.random.split(jax.random.fold_in(key, d), 11)
    layers.append(dict(
        ln1_g=1.0 + 0.05 * jax.random.normal(ks[0], (1, embed_dim), jnp.float32),
        ln1_b=0.05 * jax.random.normal(ks[1], (1, embed_dim), jnp.float32),
        wqkv=0.05 * jax.random.normal(ks[2], (embed_dim, 3 * embed_dim), jnp.float32),
        wproj=0.05 * jax.random.normal(ks[3], (embed_dim, embed_dim), jnp.float32),
        bproj=0.05 * jax.random.normal(ks[4], (1, embed_dim), jnp.float32),
        ln2_g=1.0 + 0.05 * jax.random.normal(ks[5], (1, embed_dim), jnp.float32),
        ln2_b=0.05 * jax.random.normal(ks[6], (1, embed_dim), jnp.float32),
        w1=0.05 * jax.random.normal(ks[7], (embed_dim, hidden), jnp.float32),
        b1=0.05 * jax.random.normal(ks[8], (1, hidden), jnp.float32),
        w2=0.05 * jax.random.normal(ks[9], (hidden, embed_dim), jnp.float32),
        b2=0.05 * jax.random.normal(ks[10], (1, embed_dim), jnp.float32),
    ))
  kf = jax.random.fold_in(key, depth + 1)
  kg, kb = jax.random.split(kf)
  final = dict(
      g=1.0 + 0.05 * jax.random.normal(kg, (1, embed_dim), jnp.float32),
      b=0.05 * jax.random.normal(kb, (1, embed_dim), jnp.float32),
  )
  return layers, final


# ---------------------------------------------------------------------------
# plain-JAX references
# ---------------------------------------------------------------------------
def reference_forward_f32(x, layer_params, final_params, num_heads):
  """Torch-semantics reference (f32 params, scale applied to scores)."""
  def ln(t, g, b):
    mu = t.mean(-1, keepdims=True)
    var = ((t - mu) ** 2).mean(-1, keepdims=True)
    return (t - mu) / jnp.sqrt(var + EPS) * g + b

  B, N, C = x.shape
  hd = C // num_heads
  for p in layer_params:
    h = ln(x, p['ln1_g'][0], p['ln1_b'][0])
    qkv = (h @ p['wqkv']).reshape(B, N, 3, num_heads, hd).transpose(2, 0, 3, 1, 4)
    q, k, v = qkv[0], qkv[1], qkv[2]
    attn = jnp.einsum('bhqd,bhkd->bhqk', q, k) * (hd ** -0.5)
    attn = jax.nn.softmax(attn, axis=-1)
    ctx = jnp.einsum('bhqk,bhkd->bhqd', attn, v).transpose(0, 2, 1, 3).reshape(B, N, C)
    x = x + (ctx @ p['wproj'] + p['bproj'][0])
    h2 = ln(x, p['ln2_g'][0], p['ln2_b'][0])
    m = jax.nn.gelu(h2 @ p['w1'] + p['b1'][0], approximate=False)
    x = x + (m @ p['w2'] + p['b2'][0])
  return ln(x, final_params['g'][0], final_params['b'][0])


def reference_forward_mirror(x, ep, num_heads):
  """Plain-JAX mirror of the kernel numerics (bf16 matmul operands, f32
  accumulation, scale folded into Q weight columns) using the prepped params."""
  B, N, C = x.shape
  H = num_heads
  hd = C // H
  depth = ep['wqkv'].shape[0]
  bf16 = jnp.bfloat16

  def mm(a, w):
    return jnp.dot(a.astype(bf16), w, preferred_element_type=jnp.float32)

  xs = x.reshape(B * N, C)
  for l in range(depth):
    h = _layernorm_2d(xs, ep['ln1_g'][l], ep['ln1_b'][l])
    qkv = mm(h, ep['wqkv'][l]).astype(bf16).reshape(B, N, 3, H, hd)
    qkv = qkv.transpose(2, 0, 3, 1, 4)                      # (3, B, H, N, hd)
    q, k, v = qkv[0], qkv[1], qkv[2]
    s = jnp.einsum('bhqd,bhkd->bhqk', q, k, preferred_element_type=jnp.float32)
    s = s - s.max(-1, keepdims=True)
    pe = jnp.exp(s)
    attn = (pe / pe.sum(-1, keepdims=True)).astype(bf16)
    ctx = jnp.einsum('bhqk,bhkd->bhqd', attn, v, preferred_element_type=jnp.float32)
    ctx = ctx.astype(bf16).transpose(0, 2, 1, 3).reshape(B * N, C)
    xs = xs + mm(ctx, ep['wproj'][l]) + ep['bproj'][l]
    h2 = _layernorm_2d(xs, ep['ln2_g'][l], ep['ln2_b'][l])
    m = mm(h2, ep['w1'][l]) + ep['b1'][l]
    m = _gelu_exact(m)
    xs = xs + mm(m, ep['w2'][l]) + ep['b2'][l]
  out = _layernorm_2d(xs, ep['lnf_g'], ep['lnf_b'])
  return out.reshape(B, N, C)


if __name__ == "__main__":
  B, N, embed_dim = 2, 8, 128
  depth, num_heads, mlp_ratio = 2, 4, 4.0

  key = jax.random.PRNGKey(0)
  kx, kp = jax.random.split(key)
  x = jax.random.normal(kx, (B, N, embed_dim), jnp.float32)
  layer_params, final_params = init_params(kp, embed_dim, depth, mlp_ratio)

  # One-time host-side weight prep (outside the jitted forward).
  enc_params = prepare_encoder_params(layer_params, final_params, num_heads)

  out = transformer_encoder_forward(x, enc_params, num_heads=num_heads)
  out = jax.block_until_ready(out)
  assert out.shape == (B, N, embed_dim) and out.dtype == jnp.float32

  # Tight check against a plain-JAX mirror of the kernel numerics.
  ref_mirror = jax.block_until_ready(
      reference_forward_mirror(x, enc_params, num_heads))
  err_mirror = float(jnp.max(jnp.abs(out - ref_mirror)))
  assert err_mirror < 1e-2, f"mirror mismatch: {err_mirror}"

  # Loose check against the f32 torch-semantics reference (bf16 MXU operands
  # and the approx softmax reciprocal are the only intended deviations).
  ref_f32 = jax.block_until_ready(
      reference_forward_f32(x, layer_params, final_params, num_heads))
  err_f32 = float(jnp.max(jnp.abs(out - ref_f32)))
  assert err_f32 < 5e-2, f"f32 reference mismatch: {err_f32}"

  # TODO(synk): nn.Dropout(p=0.1) layers are treated as identity (eval mode);
  # training-mode RNG dropout is not implemented in-kernel.
  # TODO(synk): for very long sequences (N >> 1024) add a query-tile grid axis
  # with an online softmax (also feeds both v7x TensorCores when B == 1).
  print("KERNEL_OK")
</pallas_src>

<mosaic_0001>
module attributes {stable_mosaic.version = 11 : i64} {
  func.func @encoder_kernel(%arg0: i32, %arg1: i32, %arg2: memref<1x8x128xf32, #tpu.memory_space<vmem>>, %arg3: memref<1x1x128xf32, #tpu.memory_space<vmem>>, %arg4: memref<1x1x128xf32, #tpu.memory_space<vmem>>, %arg5: memref<1x128x384xbf16, #tpu.memory_space<vmem>>, %arg6: memref<1x128x128xbf16, #tpu.memory_space<vmem>>, %arg7: memref<1x1x128xf32, #tpu.memory_space<vmem>>, %arg8: memref<1x1x128xf32, #tpu.memory_space<vmem>>, %arg9: memref<1x1x128xf32, #tpu.memory_space<vmem>>, %arg10: memref<1x128x512xbf16, #tpu.memory_space<vmem>>, %arg11: memref<1x1x512xf32, #tpu.memory_space<vmem>>, %arg12: memref<1x512x128xbf16, #tpu.memory_space<vmem>>, %arg13: memref<1x1x128xf32, #tpu.memory_space<vmem>>, %arg14: memref<1x128xf32, #tpu.memory_space<vmem>>, %arg15: memref<1x128xf32, #tpu.memory_space<vmem>>, %arg16: memref<1x8x128xf32, #tpu.memory_space<vmem>>, %arg17: memref<8x128xf32, #tpu.memory_space<vmem>>, %arg18: memref<4x8x32xbf16, #tpu.memory_space<vmem>>, %arg19: memref<4x8x32xbf16, #tpu.memory_space<vmem>>, %arg20: memref<4x8x32xbf16, #tpu.memory_space<vmem>>, %arg21: memref<8x128xbf16, #tpu.memory_space<vmem>>) attributes {dimension_semantics = [#tpu.dimension_semantics<parallel>, #tpu.dimension_semantics<arbitrary>], iteration_bounds = array<i64: 2, 2>, scalar_prefetch = 0 : i64, scratch_operands = 5 : i64, tpu.core_type = #tpu.core_type<tc>, window_params = [{transform_indices = @transform_0, window_bounds = array<i64: 1, 8, 128>}, {transform_indices = @transform_1, window_bounds = array<i64: 1, 1, 128>}, {transform_indices = @transform_2, window_bounds = array<i64: 1, 1, 128>}, {transform_indices = @transform_3, window_bounds = array<i64: 1, 128, 384>}, {transform_indices = @transform_4, window_bounds = array<i64: 1, 128, 128>}, {transform_indices = @transform_5, window_bounds = array<i64: 1, 1, 128>}, {transform_indices = @transform_6, window_bounds = array<i64: 1, 1, 128>}, {transform_indices = @transform_7, window_bounds = array<i64: 1, 1, 128>}, {transform_indices = @transform_8, window_bounds = array<i64: 1, 128, 512>}, {transform_indices = @transform_9, window_bounds = array<i64: 1, 1, 512>}, {transform_indices = @transform_10, window_bounds = array<i64: 1, 512, 128>}, {transform_indices = @transform_11, window_bounds = array<i64: 1, 1, 128>}, {pipeline_mode = #tpu.pipeline_mode<synchronous>, transform_indices = @transform_12, window_bounds = array<i64: 1, 128>}, {pipeline_mode = #tpu.pipeline_mode<synchronous>, transform_indices = @transform_13, window_bounds = array<i64: 1, 128>}, {transform_indices = @transform_14, window_bounds = array<i64: 1, 8, 128>}]} {
    %c0_i32 = arith.constant 0 : i32
    %0 = arith.cmpi eq, %arg1, %c0_i32 : i32
    %1 = arith.extui %0 : i1 to i32
    %c0_i32_0 = arith.constant 0 : i32
    %2 = arith.cmpi ne, %1, %c0_i32_0 : i32
    scf.if %2 {
      %c0_121 = arith.constant 0 : index
      %c0_122 = arith.constant 0 : index
      %c0_123 = arith.constant 0 : index
      %215 = vector.load %arg2[%c0_121, %c0_122, %c0_123] : memref<1x8x128xf32, #tpu.memory_space<vmem>>, vector<1x8x128xf32>
      %216 = vector.shape_cast %215 : vector<1x8x128xf32> to vector<8x128xf32>
      %c0_124 = arith.constant 0 : index
      %c0_125 = arith.constant 0 : index
      %217 = vector.load %arg17[%c0_124, %c0_125] : memref<8x128xf32, #tpu.memory_space<vmem>>, vector<8x128xf32>
      tpu.vector_store %arg17[%c0_124, %c0_125], %216 {strides = array<i32>} : memref<8x128xf32, #tpu.memory_space<vmem>>, vector<8x128xf32>,
    } else {
    }
    %c0 = arith.constant 0 : index
    %c0_1 = arith.constant 0 : index
    %3 = vector.load %arg17[%c0, %c0_1] : memref<8x128xf32, #tpu.memory_space<vmem>>, vector<8x128xf32>
    %c0_2 = arith.constant 0 : index
    %c0_3 = arith.constant 0 : index
    %c0_4 = arith.constant 0 : index
    %4 = vector.load %arg3[%c0_2, %c0_3, %c0_4] : memref<1x1x128xf32, #tpu.memory_space<vmem>>, vector<1x1x128xf32>
    %5 = vector.shape_cast %4 : vector<1x1x128xf32> to vector<1x128xf32>
    %c0_5 = arith.constant 0 : index
    %c0_6 = arith.constant 0 : index
    %c0_7 = arith.constant 0 : index
    %6 = vector.load %arg4[%c0_5, %c0_6, %c0_7] : memref<1x1x128xf32, #tpu.memory_space<vmem>>, vector<1x1x128xf32>
    %7 = vector.shape_cast %6 : vector<1x1x128xf32> to vector<1x128xf32>
    %cst = arith.constant dense<0.000000e+00> : vector<8xf32>
    %8 = vector.multi_reduction <add>, %3, %cst [1] : vector<8x128xf32> to vector<8xf32>
    %9 = vector.shape_cast %8 : vector<8xf32> to vector<8x1xf32>
    %cst_8 = arith.constant 1.280000e+02 : f32
    %10 = vector.broadcast %cst_8 : f32 to vector<8x1xf32>
    %11 = arith.divf %9, %10 : vector<8x1xf32>
    %12 = vector.broadcast %11 : vector<8x1xf32> to vector<8x128xf32>
    %13 = arith.subf %3, %12 : vector<8x128xf32>
    %14 = arith.mulf %13, %13 : vector<8x128xf32>
    %cst_9 = arith.constant dense<0.000000e+00> : vector<8xf32>
    %15 = vector.multi_reduction <add>, %14, %cst_9 [1] : vector<8x128xf32> to vector<8xf32>
    %16 = vector.shape_cast %15 : vector<8xf32> to vector<8x1xf32>
    %cst_10 = arith.constant 1.280000e+02 : f32
    %17 = vector.broadcast %cst_10 : f32 to vector<8x1xf32>
    %18 = arith.divf %16, %17 : vector<8x1xf32>
    %19 = vector.broadcast %11 : vector<8x1xf32> to vector<8x128xf32>
    %20 = arith.subf %3, %19 : vector<8x128xf32>
    %cst_11 = arith.constant 9.99999974E-6 : f32
    %21 = vector.broadcast %cst_11 : f32 to vector<8x1xf32>
    %22 = arith.addf %18, %21 : vector<8x1xf32>
    %23 = math.rsqrt %22 : vector<8x1xf32>
    %24 = vector.broadcast %23 : vector<8x1xf32> to vector<8x128xf32>
    %25 = arith.mulf %20, %24 : vector<8x128xf32>
    %26 = vector.broadcast %5 : vector<1x128xf32> to vector<8x128xf32>
    %27 = arith.mulf %25, %26 : vector<8x128xf32>
    %28 = vector.broadcast %7 : vector<1x128xf32> to vector<8x128xf32>
    %29 = arith.addf %27, %28 : vector<8x128xf32>
    %30 = arith.truncf %29 : vector<8x128xf32> to vector<8x128xbf16>
    %c0_12 = arith.constant 0 : index
    %c0_13 = arith.constant 0 : index
    %c0_14 = arith.constant 0 : index
    %31 = vector.load %arg5[%c0_12, %c0_13, %c0_14] : memref<1x128x384xbf16, #tpu.memory_space<vmem>>, vector<1x128x384xbf16>
    %32 = vector.shape_cast %31 : vector<1x128x384xbf16> to vector<128x384xbf16>
    %cst_15 = arith.constant dense<0.000000e+00> : vector<8x384xf32>
    %33 = tpu.matmul %30, %32, %cst_15 {dimension_numbers = #tpu.dot_dimension_numbers<[1], [0], [0], [1], [0, 0, 1, 1], [], []>} : vector<8x128xbf16>, vector<128x384xbf16>, vector<8x384xf32> -> vector<8x384xf32>
    %34 = arith.truncf %33 : vector<8x384xf32> to vector<8x384xbf16>
    %35 = vector.extract_strided_slice %34 {offsets = [0, 0], sizes = [8, 32], strides = [1, 1]} : vector<8x384xbf16> to vector<8x32xbf16>
    %c0_16 = arith.constant 0 : index
    %c0_17 = arith.constant 0 : index
    %c0_18 = arith.constant 0 : index
    %36 = vector.load %arg18[%c0_16, %c0_17, %c0_18] : memref<4x8x32xbf16, #tpu.memory_space<vmem>>, vector<1x8x32xbf16>
    %37 = vector.shape_cast %36 : vector<1x8x32xbf16> to vector<8x32xbf16>
    %38 = vector.shape_cast %35 : vector<8x32xbf16> to vector<1x8x32xbf16>
    tpu.vector_store %arg18[%c0_16, %c0_17, %c0_18], %38 {strides = array<i32>} : memref<4x8x32xbf16, #tpu.memory_space<vmem>>, vector<1x8x32xbf16>,
    %39 = vector.extract_strided_slice %34 {offsets = [0, 128], sizes = [8, 32], strides = [1, 1]} : vector<8x384xbf16> to vector<8x32xbf16>
    %c0_19 = arith.constant 0 : index
    %c0_20 = arith.constant 0 : index
    %c0_21 = arith.constant 0 : index
    %40 = vector.load %arg19[%c0_19, %c0_20, %c0_21] : memref<4x8x32xbf16, #tpu.memory_space<vmem>>, vector<1x8x32xbf16>
    %41 = vector.shape_cast %40 : vector<1x8x32xbf16> to vector<8x32xbf16>
    %42 = vector.shape_cast %39 : vector<8x32xbf16> to vector<1x8x32xbf16>
    tpu.vector_store %arg19[%c0_19, %c0_20, %c0_21], %42 {strides = array<i32>} : memref<4x8x32xbf16, #tpu.memory_space<vmem>>, vector<1x8x32xbf16>,
    %43 = vector.extract_strided_slice %34 {offsets = [0, 256], sizes = [8, 32], strides = [1, 1]} : vector<8x384xbf16> to vector<8x32xbf16>
    %c0_22 = arith.constant 0 : index
    %c0_23 = arith.constant 0 : index
    %c0_24 = arith.constant 0 : index
    %44 = vector.load %arg20[%c0_22, %c0_23, %c0_24] : memref<4x8x32xbf16, #tpu.memory_space<vmem>>, vector<1x8x32xbf16>
    %45 = vector.shape_cast %44 : vector<1x8x32xbf16> to vector<8x32xbf16>
    %46 = vector.shape_cast %43 : vector<8x32xbf16> to vector<1x8x32xbf16>
    tpu.vector_store %arg20[%c0_22, %c0_23, %c0_24], %46 {strides = array<i32>} : memref<4x8x32xbf16, #tpu.memory_space<vmem>>, vector<1x8x32xbf16>,
    %47 = vector.extract_strided_slice %34 {offsets = [0, 32], sizes = [8, 32], strides = [1, 1]} : vector<8x384xbf16> to vector<8x32xbf16>
    %c1 = arith.constant 1 : index
    %c0_25 = arith.constant 0 : index
    %c0_26 = arith.constant 0 : index
    %48 = vector.load %arg18[%c1, %c0_25, %c0_26] : memref<4x8x32xbf16, #tpu.memory_space<vmem>>, vector<1x8x32xbf16>
    %49 = vector.shape_cast %48 : vector<1x8x32xbf16> to vector<8x32xbf16>
    %50 = vector.shape_cast %47 : vector<8x32xbf16> to vector<1x8x32xbf16>
    tpu.vector_store %arg18[%c1, %c0_25, %c0_26], %50 {strides = array<i32>} : memref<4x8x32xbf16, #tpu.memory_space<vmem>>, vector<1x8x32xbf16>,
    %51 = vector.extract_strided_slice %34 {offsets = [0, 160], sizes = [8, 32], strides = [1, 1]} : vector<8x384xbf16> to vector<8x32xbf16>
    %c1_27 = arith.constant 1 : index
    %c0_28 = arith.constant 0 : index
    %c0_29 = arith.constant 0 : index
    %52 = vector.load %arg19[%c1_27, %c0_28, %c0_29] : memref<4x8x32xbf16, #tpu.memory_space<vmem>>, vector<1x8x32xbf16>
    %53 = vector.shape_cast %52 : vector<1x8x32xbf16> to vector<8x32xbf16>
    %54 = vector.shape_cast %51 : vector<8x32xbf16> to vector<1x8x32xbf16>
    tpu.vector_store %arg19[%c1_27, %c0_28, %c0_29], %54 {strides = array<i32>} : memref<4x8x32xbf16, #tpu.memory_space<vmem>>, vector<1x8x32xbf16>,
    %55 = vector.extract_strided_slice %34 {offsets = [0, 288], sizes = [8, 32], strides = [1, 1]} : vector<8x384xbf16> to vector<8x32xbf16>
    %c1_30 = arith.constant 1 : index
    %c0_31 = arith.constant 0 : index
    %c0_32 = arith.constant 0 : index
    %56 = vector.load %arg20[%c1_30, %c0_31, %c0_32] : memref<4x8x32xbf16, #tpu.memory_space<vmem>>, vector<1x8x32xbf16>
    %57 = vector.shape_cast %56 : vector<1x8x32xbf16> to vector<8x32xbf16>
    %58 = vector.shape_cast %55 : vector<8x32xbf16> to vector<1x8x32xbf16>
    tpu.vector_store %arg20[%c1_30, %c0_31, %c0_32], %58 {strides = array<i32>} : memref<4x8x32xbf16, #tpu.memory_space<vmem>>, vector<1x8x32xbf16>,
    %59 = vector.extract_strided_slice %34 {offsets = [0, 64], sizes = [8, 32], strides = [1, 1]} : vector<8x384xbf16> to vector<8x32xbf16>
    %c2 = arith.constant 2 : index
    %c0_33 = arith.constant 0 : index
    %c0_34 = arith.constant 0 : index
    %60 = vector.load %arg18[%c2, %c0_33, %c0_34] : memref<4x8x32xbf16, #tpu.memory_space<vmem>>, vector<1x8x32xbf16>
    %61 = vector.shape_cast %60 : vector<1x8x32xbf16> to vector<8x32xbf16>
    %62 = vector.shape_cast %59 : vector<8x32xbf16> to vector<1x8x32xbf16>
    tpu.vector_store %arg18[%c2, %c0_33, %c0_34], %62 {strides = array<i32>} : memref<4x8x32xbf16, #tpu.memory_space<vmem>>, vector<1x8x32xbf16>,
    %63 = vector.extract_strided_slice %34 {offsets = [0, 192], sizes = [8, 32], strides = [1, 1]} : vector<8x384xbf16> to vector<8x32xbf16>
    %c2_35 = arith.constant 2 : index
    %c0_36 = arith.constant 0 : index
    %c0_37 = arith.constant 0 : index
    %64 = vector.load %arg19[%c2_35, %c0_36, %c0_37] : memref<4x8x32xbf16, #tpu.memory_space<vmem>>, vector<1x8x32xbf16>
    %65 = vector.shape_cast %64 : vector<1x8x32xbf16> to vector<8x32xbf16>
    %66 = vector.shape_cast %63 : vector<8x32xbf16> to vector<1x8x32xbf16>
    tpu.vector_store %arg19[%c2_35, %c0_36, %c0_37], %66 {strides = array<i32>} : memref<4x8x32xbf16, #tpu.memory_space<vmem>>, vector<1x8x32xbf16>,
    %67 = vector.extract_strided_slice %34 {offsets = [0, 320], sizes = [8, 32], strides = [1, 1]} : vector<8x384xbf16> to vector<8x32xbf16>
    %c2_38 = arith.constant 2 : index
    %c0_39 = arith.constant 0 : index
    %c0_40 = arith.constant 0 : index
    %68 = vector.load %arg20[%c2_38, %c0_39, %c0_40] : memref<4x8x32xbf16, #tpu.memory_space<vmem>>, vector<1x8x32xbf16>
    %69 = vector.shape_cast %68 : vector<1x8x32xbf16> to vector<8x32xbf16>
    %70 = vector.shape_cast %67 : vector<8x32xbf16> to vector<1x8x32xbf16>
    tpu.vector_store %arg20[%c2_38, %c0_39, %c0_40], %70 {strides = array<i32>} : memref<4x8x32xbf16, #tpu.memory_space<vmem>>, vector<1x8x32xbf16>,
    %71 = vector.extract_strided_slice %34 {offsets = [0, 96], sizes = [8, 32], strides = [1, 1]} : vector<8x384xbf16> to vector<8x32xbf16>
    %c3 = arith.constant 3 : index
    %c0_41 = arith.constant 0 : index
    %c0_42 = arith.constant 0 : index
    %72 = vector.load %arg18[%c3, %c0_41, %c0_42] : memref<4x8x32xbf16, #tpu.memory_space<vmem>>, vector<1x8x32xbf16>
    %73 = vector.shape_cast %72 : vector<1x8x32xbf16> to vector<8x32xbf16>
    %74 = vector.shape_cast %71 : vector<8x32xbf16> to vector<1x8x32xbf16>
    tpu.vector_store %arg18[%c3, %c0_41, %c0_42], %74 {strides = array<i32>} : memref<4x8x32xbf16, #tpu.memory_space<vmem>>, vector<1x8x32xbf16>,
    %75 = vector.extract_strided_slice %34 {offsets = [0, 224], sizes = [8, 32], strides = [1, 1]} : vector<8x384xbf16> to vector<8x32xbf16>
    %c3_43 = arith.constant 3 : index
    %c0_44 = arith.constant 0 : index
    %c0_45 = arith.constant 0 : index
    %76 = vector.load %arg19[%c3_43, %c0_44, %c0_45] : memref<4x8x32xbf16, #tpu.memory_space<vmem>>, vector<1x8x32xbf16>
    %77 = vector.shape_cast %76 : vector<1x8x32xbf16> to vector<8x32xbf16>
    %78 = vector.shape_cast %75 : vector<8x32xbf16> to vector<1x8x32xbf16>
    tpu.vector_store %arg19[%c3_43, %c0_44, %c0_45], %78 {strides = array<i32>} : memref<4x8x32xbf16, #tpu.memory_space<vmem>>, vector<1x8x32xbf16>,
    %79 = vector.extract_strided_slice %34 {offsets = [0, 352], sizes = [8, 32], strides = [1, 1]} : vector<8x384xbf16> to vector<8x32xbf16>
    %c3_46 = arith.constant 3 : index
    %c0_47 = arith.constant 0 : index
    %c0_48 = arith.constant 0 : index
    %80 = vector.load %arg20[%c3_46, %c0_47, %c0_48] : memref<4x8x32xbf16, #tpu.memory_space<vmem>>, vector<1x8x32xbf16>
    %81 = vector.shape_cast %80 : vector<1x8x32xbf16> to vector<8x32xbf16>
    %82 = vector.shape_cast %79 : vector<8x32xbf16> to vector<1x8x32xbf16>
    tpu.vector_store %arg20[%c3_46, %c0_47, %c0_48], %82 {strides = array<i32>} : memref<4x8x32xbf16, #tpu.memory_space<vmem>>, vector<1x8x32xbf16>,
    %c0_49 = arith.constant 0 : index
    %c0_50 = arith.constant 0 : index
    %c0_51 = arith.constant 0 : index
    %83 = vector.load %arg18[%c0_49, %c0_50, %c0_51] : memref<4x8x32xbf16, #tpu.memory_space<vmem>>, vector<4x8x32xbf16>
    %c0_52 = arith.constant 0 : index
    %c0_53 = arith.constant 0 : index
    %c0_54 = arith.constant 0 : index
    %84 = vector.load %arg19[%c0_52, %c0_53, %c0_54] : memref<4x8x32xbf16, #tpu.memory_space<vmem>>, vector<4x8x32xbf16>
    %c0_55 = arith.constant 0 : index
    %c0_56 = arith.constant 0 : index
    %c0_57 = arith.constant 0 : index
    %85 = vector.load %arg20[%c0_55, %c0_56, %c0_57] : memref<4x8x32xbf16, #tpu.memory_space<vmem>>, vector<4x8x32xbf16>
    "tpu.trace_start"() <{level = 10 : i32, message = "hqd,hkd->hqk"}> : () -> ()
    %cst_58 = arith.constant dense<0.000000e+00> : vector<4x8x8xf32>
    %86 = tpu.matmul %83, %84, %cst_58 {dimension_numbers = #tpu.dot_dimension_numbers<[2], [2], [1], [1], [0, 0, 0, 1, 1, 1], [0], [0]>} : vector<4x8x32xbf16>, vector<4x8x32xbf16>, vector<4x8x8xf32> -> vector<4x8x8xf32>
    "tpu.trace_stop"() : () -> ()
    %cst_59 = arith.constant dense<0xFF800000> : vector<4x8xf32>
    %87 = vector.multi_reduction <maximumf>, %86, %cst_59 [2] : vector<4x8x8xf32> to vector<4x8xf32>
    %88 = vector.shape_cast %87 : vector<4x8xf32> to vector<4x8x1xf32>
    %89 = vector.broadcast %88 : vector<4x8x1xf32> to vector<4x8x8xf32>
    %90 = arith.subf %86, %89 : vector<4x8x8xf32>
    %91 = math.exp %90 : vector<4x8x8xf32>
    %cst_60 = arith.constant dense<0.000000e+00> : vector<4x8xf32>
    %92 = vector.multi_reduction <add>, %91, %cst_60 [2] : vector<4x8x8xf32> to vector<4x8xf32>
    %93 = vector.shape_cast %92 : vector<4x8xf32> to vector<4x8x1xf32>
    %94 = tpu.reciprocal %93 {approx = true} : vector<4x8x1xf32> -> vector<4x8x1xf32>
    %95 = vector.broadcast %94 : vector<4x8x1xf32> to vector<4x8x8xf32>
    %96 = arith.mulf %91, %95 : vector<4x8x8xf32>
    %97 = arith.truncf %96 : vector<4x8x8xf32> to vector<4x8x8xbf16>
    "tpu.trace_start"() <{level = 10 : i32, message = "hqk,hkd->hqd"}> : () -> ()
    %cst_61 = arith.constant dense<0.000000e+00> : vector<4x8x32xf32>
    %98 = tpu.matmul %97, %85, %cst_61 {dimension_numbers = #tpu.dot_dimension_numbers<[2], [1], [1], [2], [0, 0, 0, 1, 1, 2], [0], [0]>} : vector<4x8x8xbf16>, vector<4x8x32xbf16>, vector<4x8x32xf32> -> vector<4x8x32xf32>
    "tpu.trace_stop"() : () -> ()
    %99 = arith.truncf %98 : vector<4x8x32xf32> to vector<4x8x32xbf16>
    %100 = vector.extract_strided_slice %99 {offsets = [0, 0, 0], sizes = [1, 8, 32], strides = [1, 1, 1]} : vector<4x8x32xbf16> to vector<1x8x32xbf16>
    %101 = vector.shape_cast %100 : vector<1x8x32xbf16> to vector<8x32xbf16>
    %c0_62 = arith.constant 0 : index
    %c0_63 = arith.constant 0 : index
    %102 = vector.load %arg21[%c0_62, %c0_63] : memref<8x128xbf16, #tpu.memory_space<vmem>>, vector<8x32xbf16>
    tpu.vector_store %arg21[%c0_62, %c0_63], %101 {strides = array<i32>} : memref<8x128xbf16, #tpu.memory_space<vmem>>, vector<8x32xbf16>,
    %103 = vector.extract_strided_slice %99 {offsets = [1, 0, 0], sizes = [1, 8, 32], strides = [1, 1, 1]} : vector<4x8x32xbf16> to vector<1x8x32xbf16>
    %104 = vector.shape_cast %103 : vector<1x8x32xbf16> to vector<8x32xbf16>
    %c0_64 = arith.constant 0 : index
    %c32 = arith.constant 32 : index
    %105 = vector.load %arg21[%c0_64, %c32] : memref<8x128xbf16, #tpu.memory_space<vmem>>, vector<8x32xbf16>
    tpu.vector_store %arg21[%c0_64, %c32], %104 {strides = array<i32>} : memref<8x128xbf16, #tpu.memory_space<vmem>>, vector<8x32xbf16>,
    %106 = vector.extract_strided_slice %99 {offsets = [2, 0, 0], sizes = [1, 8, 32], strides = [1, 1, 1]} : vector<4x8x32xbf16> to vector<1x8x32xbf16>
    %107 = vector.shape_cast %106 : vector<1x8x32xbf16> to vector<8x32xbf16>
    %c0_65 = arith.constant 0 : index
    %c64 = arith.constant 64 : index
    %108 = vector.load %arg21[%c0_65, %c64] : memref<8x128xbf16, #tpu.memory_space<vmem>>, vector<8x32xbf16>
    tpu.vector_store %arg21[%c0_65, %c64], %107 {strides = array<i32>} : memref<8x128xbf16, #tpu.memory_space<vmem>>, vector<8x32xbf16>,
    %109 = vector.extract_strided_slice %99 {offsets = [3, 0, 0], sizes = [1, 8, 32], strides = [1, 1, 1]} : vector<4x8x32xbf16> to vector<1x8x32xbf16>
    %110 = vector.shape_cast %109 : vector<1x8x32xbf16> to vector<8x32xbf16>
    %c0_66 = arith.constant 0 : index
    %c96 = arith.constant 96 : index
    %111 = vector.load %arg21[%c0_66, %c96] : memref<8x128xbf16, #tpu.memory_space<vmem>>, vector<8x32xbf16>
    tpu.vector_store %arg21[%c0_66, %c96], %110 {strides = array<i32>} : memref<8x128xbf16, #tpu.memory_space<vmem>>, vector<8x32xbf16>,
    %c0_67 = arith.constant 0 : index
    %c0_68 = arith.constant 0 : index
    %112 = vector.load %arg21[%c0_67, %c0_68] : memref<8x128xbf16, #tpu.memory_space<vmem>>, vector<8x128xbf16>
    %c0_69 = arith.constant 0 : index
    %c0_70 = arith.constant 0 : index
    %c0_71 = arith.constant 0 : index
    %113 = vector.load %arg6[%c0_69, %c0_70, %c0_71] : memref<1x128x128xbf16, #tpu.memory_space<vmem>>, vector<1x128x128xbf16>
    %114 = vector.shape_cast %113 : vector<1x128x128xbf16> to vector<128x128xbf16>
    %cst_72 = arith.constant dense<0.000000e+00> : vector<8x128xf32>
    %115 = tpu.matmul %112, %114, %cst_72 {dimension_numbers = #tpu.dot_dimension_numbers<[1], [0], [0], [1], [0, 0, 1, 1], [], []>} : vector<8x128xbf16>, vector<128x128xbf16>, vector<8x128xf32> -> vector<8x128xf32>
    %116 = arith.addf %3, %115 : vector<8x128xf32>
    %c0_73 = arith.constant 0 : index
    %c0_74 = arith.constant 0 : index
    %c0_75 = arith.constant 0 : index
    %117 = vector.load %arg7[%c0_73, %c0_74, %c0_75] : memref<1x1x128xf32, #tpu.memory_space<vmem>>, vector<1x1x128xf32>
    %118 = vector.shape_cast %117 : vector<1x1x128xf32> to vector<1x128xf32>
    %119 = vector.broadcast %118 : vector<1x128xf32> to vector<8x128xf32>
    %120 = arith.addf %116, %119 : vector<8x128xf32>
    %c0_76 = arith.constant 0 : index
    %c0_77 = arith.constant 0 : index
    %c0_78 = arith.constant 0 : index
    %121 = vector.load %arg8[%c0_76, %c0_77, %c0_78] : memref<1x1x128xf32, #tpu.memory_space<vmem>>, vector<1x1x128xf32>
    %122 = vector.shape_cast %121 : vector<1x1x128xf32> to vector<1x128xf32>
    %c0_79 = arith.constant 0 : index
    %c0_80 = arith.constant 0 : index
    %c0_81 = arith.constant 0 : index
    %123 = vector.load %arg9[%c0_79, %c0_80, %c0_81] : memref<1x1x128xf32, #tpu.memory_space<vmem>>, vector<1x1x128xf32>
    %124 = vector.shape_cast %123 : vector<1x1x128xf32> to vector<1x128xf32>
    %cst_82 = arith.constant dense<0.000000e+00> : vector<8xf32>
    %125 = vector.multi_reduction <add>, %120, %cst_82 [1] : vector<8x128xf32> to vector<8xf32>
    %126 = vector.shape_cast %125 : vector<8xf32> to vector<8x1xf32>
    %cst_83 = arith.constant 1.280000e+02 : f32
    %127 = vector.broadcast %cst_83 : f32 to vector<8x1xf32>
    %128 = arith.divf %126, %127 : vector<8x1xf32>
    %129 = vector.broadcast %128 : vector<8x1xf32> to vector<8x128xf32>
    %130 = arith.subf %120, %129 : vector<8x128xf32>
    %131 = arith.mulf %130, %130 : vector<8x128xf32>
    %cst_84 = arith.constant dense<0.000000e+00> : vector<8xf32>
    %132 = vector.multi_reduction <add>, %131, %cst_84 [1] : vector<8x128xf32> to vector<8xf32>
    %133 = vector.shape_cast %132 : vector<8xf32> to vector<8x1xf32>
    %cst_85 = arith.constant 1.280000e+02 : f32
    %134 = vector.broadcast %cst_85 : f32 to vector<8x1xf32>
    %135 = arith.divf %133, %134 : vector<8x1xf32>
    %136 = vector.broadcast %128 : vector<8x1xf32> to vector<8x128xf32>
    %137 = arith.subf %120, %136 : vector<8x128xf32>
    %cst_86 = arith.constant 9.99999974E-6 : f32
    %138 = vector.broadcast %cst_86 : f32 to vector<8x1xf32>
    %139 = arith.addf %135, %138 : vector<8x1xf32>
    %140 = math.rsqrt %139 : vector<8x1xf32>
    %141 = vector.broadcast %140 : vector<8x1xf32> to vector<8x128xf32>
    %142 = arith.mulf %137, %141 : vector<8x128xf32>
    %143 = vector.broadcast %122 : vector<1x128xf32> to vector<8x128xf32>
    %144 = arith.mulf %142, %143 : vector<8x128xf32>
    %145 = vector.broadcast %124 : vector<1x128xf32> to vector<8x128xf32>
    %146 = arith.addf %144, %145 : vector<8x128xf32>
    %147 = arith.truncf %146 : vector<8x128xf32> to vector<8x128xbf16>
    %c0_87 = arith.constant 0 : index
    %c0_88 = arith.constant 0 : index
    %c0_89 = arith.constant 0 : index
    %148 = vector.load %arg10[%c0_87, %c0_88, %c0_89] : memref<1x128x512xbf16, #tpu.memory_space<vmem>>, vector<1x128x512xbf16>
    %149 = vector.shape_cast %148 : vector<1x128x512xbf16> to vector<128x512xbf16>
    %cst_90 = arith.constant dense<0.000000e+00> : vector<8x512xf32>
    %150 = tpu.matmul %147, %149, %cst_90 {dimension_numbers = #tpu.dot_dimension_numbers<[1], [0], [0], [1], [0, 0, 1, 1], [], []>} : vector<8x128xbf16>, vector<128x512xbf16>, vector<8x512xf32> -> vector<8x512xf32>
    %c0_91 = arith.constant 0 : index
    %c0_92 = arith.constant 0 : index
    %c0_93 = arith.constant 0 : index
    %151 = vector.load %arg11[%c0_91, %c0_92, %c0_93] : memref<1x1x512xf32, #tpu.memory_space<vmem>>, vector<1x1x512xf32>
    %152 = vector.shape_cast %151 : vector<1x1x512xf32> to vector<1x512xf32>
    %153 = vector.broadcast %152 : vector<1x512xf32> to vector<8x512xf32>
    %154 = arith.addf %150, %153 : vector<8x512xf32>
    %cst_94 = arith.constant 5.000000e-01 : f32
    %155 = vector.broadcast %cst_94 : f32 to vector<8x512xf32>
    %156 = arith.mulf %155, %154 : vector<8x512xf32>
    %cst_95 = arith.constant 0.707106769 : f32
    %157 = vector.broadcast %cst_95 : f32 to vector<8x512xf32>
    %158 = arith.mulf %154, %157 : vector<8x512xf32>
    %cst_96 = arith.constant -4.000000e+00 : f32
    %cst_97 = arith.constant 4.000000e+00 : f32
    %159 = vector.broadcast %cst_96 : f32 to vector<8x512xf32>
    %160 = arith.maximumf %159, %158 : vector<8x512xf32>
    %161 = vector.broadcast %cst_97 : f32 to vector<8x512xf32>
    %162 = arith.minimumf %161, %160 : vector<8x512xf32>
    %163 = arith.mulf %162, %162 : vector<8x512xf32>
    %cst_98 = arith.constant -2.72614237E-10 : f32
    %164 = vector.broadcast %cst_98 : f32 to vector<8x512xf32>
    %165 = arith.mulf %164, %163 : vector<8x512xf32>
    %cst_99 = arith.constant 2.77068146E-8 : f32
    %166 = vector.broadcast %cst_99 : f32 to vector<8x512xf32>
    %167 = arith.addf %165, %166 : vector<8x512xf32>
    %168 = arith.mulf %167, %163 : vector<8x512xf32>
    %cst_100 = arith.constant -2.10102394E-6 : f32
    %169 = vector.broadcast %cst_100 : f32 to vector<8x512xf32>
    %170 = arith.addf %168, %169 : vector<8x512xf32>
    %171 = arith.mulf %170, %163 : vector<8x512xf32>
    %cst_101 = arith.constant -5.69250624E-5 : f32
    %172 = vector.broadcast %cst_101 : f32 to vector<8x512xf32>
    %173 = arith.addf %171, %172 : vector<8x512xf32>
    %174 = arith.mulf %173, %163 : vector<8x512xf32>
    %cst_102 = arith.constant -7.34990637E-4 : f32
    %175 = vector.broadcast %cst_102 : f32 to vector<8x512xf32>
    %176 = arith.addf %174, %175 : vector<8x512xf32>
    %177 = arith.mulf %176, %163 : vector<8x512xf32>
    %cst_103 = arith.constant -2.954600e-03 : f32
    %178 = vector.broadcast %cst_103 : f32 to vector<8x512xf32>
    %179 = arith.addf %177, %178 : vector<8x512xf32>
    %180 = arith.mulf %179, %163 : vector<8x512xf32>
    %cst_104 = arith.constant -0.0160960332 : f32
    %181 = vector.broadcast %cst_104 : f32 to vector<8x512xf32>
    %182 = arith.addf %180, %181 : vector<8x512xf32>
    %183 = arith.mulf %162, %182 : vector<8x512xf32>
    %cst_105 = arith.constant -1.45660715E-5 : f32
    %184 = vector.broadcast %cst_105 : f32 to vector<8x512xf32>
    %185 = arith.mulf %184, %163 : vector<8x512xf32>
    %cst_106 = arith.constant -2.13374049E-4 : f32
    %186 = vector.broadcast %cst_106 : f32 to vector<8x512xf32>
    %187 = arith.addf %185, %186 : vector<8x512xf32>
    %188 = arith.mulf %187, %163 : vector<8x512xf32>
    %cst_107 = arith.constant -0.00168282702 : f32
    %189 = vector.broadcast %cst_107 : f32 to vector<8x512xf32>
    %190 = arith.addf %188, %189 : vector<8x512xf32>
    %191 = arith.mulf %190, %163 : vector<8x512xf32>
    %cst_108 = arith.constant -0.00737332925 : f32
    %192 = vector.broadcast %cst_108 : f32 to vector<8x512xf32>
    %193 = arith.addf %191, %192 : vector<8x512xf32>
    %194 = arith.mulf %193, %163 : vector<8x512xf32>
    %cst_109 = arith.constant -0.0142647391 : f32
    %195 = vector.broadcast %cst_109 : f32 to vector<8x512xf32>
    %196 = arith.addf %194, %195 : vector<8x512xf32>
    %197 = tpu.reciprocal %196 : vector<8x512xf32> -> vector<8x512xf32>
    %198 = arith.mulf %183, %197 : vector<8x512xf32>
    %cst_110 = arith.constant 1.000000e+00 : f32
    %199 = vector.broadcast %cst_110 : f32 to vector<8x512xf32>
    %200 = arith.addf %199, %198 : vector<8x512xf32>
    %201 = arith.mulf %156, %200 : vector<8x512xf32>
    %202 = arith.truncf %201 : vector<8x512xf32> to vector<8x512xbf16>
    %c0_111 = arith.constant 0 : index
    %c0_112 = arith.constant 0 : index
    %c0_113 = arith.constant 0 : index
    %203 = vector.load %arg12[%c0_111, %c0_112, %c0_113] : memref<1x512x128xbf16, #tpu.memory_space<vmem>>, vector<1x512x128xbf16>
    %204 = vector.shape_cast %203 : vector<1x512x128xbf16> to vector<512x128xbf16>
    %cst_114 = arith.constant dense<0.000000e+00> : vector<8x128xf32>
    %205 = tpu.matmul %202, %204, %cst_114 {dimension_numbers = #tpu.dot_dimension_numbers<[1], [0], [0], [1], [0, 0, 1, 1], [], []>} : vector<8x512xbf16>, vector<512x128xbf16>, vector<8x128xf32> -> vector<8x128xf32>
    %c0_115 = arith.constant 0 : index
    %c0_116 = arith.constant 0 : index
    %c0_117 = arith.constant 0 : index
    %206 = vector.load %arg13[%c0_115, %c0_116, %c0_117] : memref<1x1x128xf32, #tpu.memory_space<vmem>>, vector<1x1x128xf32>
    %207 = vector.shape_cast %206 : vector<1x1x128xf32> to vector<1x128xf32>
    %208 = vector.broadcast %207 : vector<1x128xf32> to vector<8x128xf32>
    %209 = arith.addf %205, %208 : vector<8x128xf32>
    %210 = arith.addf %120, %209 : vector<8x128xf32>
    %c0_118 = arith.constant 0 : index
    %c0_119 = arith.constant 0 : index
    %211 = vector.load %arg17[%c0_118, %c0_119] : memref<8x128xf32, #tpu.memory_space<vmem>>, vector<8x128xf32>
    tpu.vector_store %arg17[%c0_118, %c0_119], %210 {strides = array<i32>} : memref<8x128xf32, #tpu.memory_space<vmem>>, vector<8x128xf32>,
    %c1_i32 = arith.constant 1 : i32
    %212 = arith.cmpi eq, %arg1, %c1_i32 : i32
    %213 = arith.extui %212 : i1 to i32
    %c0_i32_120 = arith.constant 0 : i32
    %214 = arith.cmpi ne, %213, %c0_i32_120 : i32
    scf.if %214 {
      %c0_121 = arith.constant 0 : index
      %c0_122 = arith.constant 0 : index
      %215 = vector.load %arg14[%c0_121, %c0_122] : memref<1x128xf32, #tpu.memory_space<vmem>>, vector<1x128xf32>
      %c0_123 = arith.constant 0 : index
      %c0_124 = arith.constant 0 : index
      %216 = vector.load %arg15[%c0_123, %c0_124] : memref<1x128xf32, #tpu.memory_space<vmem>>, vector<1x128xf32>
      %cst_125 = arith.constant dense<0.000000e+00> : vector<8xf32>
      %217 = vector.multi_reduction <add>, %210, %cst_125 [1] : vector<8x128xf32> to vector<8xf32>
      %218 = vector.shape_cast %217 : vector<8xf32> to vector<8x1xf32>
      %cst_126 = arith.constant 1.280000e+02 : f32
      %219 = vector.broadcast %cst_126 : f32 to vector<8x1xf32>
      %220 = arith.divf %218, %219 : vector<8x1xf32>
      %221 = vector.broadcast %220 : vector<8x1xf32> to vector<8x128xf32>
      %222 = arith.subf %210, %221 : vector<8x128xf32>
      %223 = arith.mulf %222, %222 : vector<8x128xf32>
      %cst_127 = arith.constant dense<0.000000e+00> : vector<8xf32>
      %224 = vector.multi_reduction <add>, %223, %cst_127 [1] : vector<8x128xf32> to vector<8xf32>
      %225 = vector.shape_cast %224 : vector<8xf32> to vector<8x1xf32>
      %cst_128 = arith.constant 1.280000e+02 : f32
      %226 = vector.broadcast %cst_128 : f32 to vector<8x1xf32>
      %227 = arith.divf %225, %226 : vector<8x1xf32>
      %228 = vector.broadcast %220 : vector<8x1xf32> to vector<8x128xf32>
      %229 = arith.subf %210, %228 : vector<8x128xf32>
      %cst_129 = arith.constant 9.99999974E-6 : f32
      %230 = vector.broadcast %cst_129 : f32 to vector<8x1xf32>
      %231 = arith.addf %227, %230 : vector<8x1xf32>
      %232 = math.rsqrt %231 : vector<8x1xf32>
      %233 = vector.broadcast %232 : vector<8x1xf32> to vector<8x128xf32>
      %234 = arith.mulf %229, %233 : vector<8x128xf32>
      %235 = vector.broadcast %215 : vector<1x128xf32> to vector<8x128xf32>
      %236 = arith.mulf %234, %235 : vector<8x128xf32>
      %237 = vector.broadcast %216 : vector<1x128xf32> to vector<8x128xf32>
      %238 = arith.addf %236, %237 : vector<8x128xf32>
      %c0_130 = arith.constant 0 : index
      %c0_131 = arith.constant 0 : index
      %c0_132 = arith.constant 0 : index
      %239 = vector.load %arg16[%c0_130, %c0_131, %c0_132] : memref<1x8x128xf32, #tpu.memory_space<vmem>>, vector<1x8x128xf32>
      %240 = vector.shape_cast %239 : vector<1x8x128xf32> to vector<8x128xf32>
      %241 = vector.shape_cast %238 : vector<8x128xf32> to vector<1x8x128xf32>
      tpu.vector_store %arg16[%c0_130, %c0_131, %c0_132], %241 {strides = array<i32>} : memref<1x8x128xf32, #tpu.memory_space<vmem>>, vector<1x8x128xf32>,
    } else {
    }
    return
  }
  func.func @transform_0(%arg0: i32, %arg1: i32) -> (i32, i32, i32) {
    %c0_i32 = arith.constant 0 : i32
    %c0_i32_0 = arith.constant 0 : i32
    %c0_i32_1 = arith.constant 0 : i32
    return %arg0, %c0_i32, %c0_i32_0 : i32, i32, i32
  }
  func.func @transform_1(%arg0: i32, %arg1: i32) -> (i32, i32, i32) {
    %c0_i32 = arith.constant 0 : i32
    %c0_i32_0 = arith.constant 0 : i32
    %c0_i32_1 = arith.constant 0 : i32
    return %arg1, %c0_i32, %c0_i32_0 : i32, i32, i32
  }
  func.func @transform_2(%arg0: i32, %arg1: i32) -> (i32, i32, i32) {
    %c0_i32 = arith.constant 0 : i32
    %c0_i32_0 = arith.constant 0 : i32
    %c0_i32_1 = arith.constant 0 : i32
    return %arg1, %c0_i32, %c0_i32_0 : i32, i32, i32
  }
  func.func @transform_3(%arg0: i32, %arg1: i32) -> (i32, i32, i32) {
    %c0_i32 = arith.constant 0 : i32
    %c0_i32_0 = arith.constant 0 : i32
    %c0_i32_1 = arith.constant 0 : i32
    return %arg1, %c0_i32, %c0_i32_0 : i32, i32, i32
  }
  func.func @transform_4(%arg0: i32, %arg1: i32) -> (i32, i32, i32) {
    %c0_i32 = arith.constant 0 : i32
    %c0_i32_0 = arith.constant 0 : i32
    %c0_i32_1 = arith.constant 0 : i32
    return %arg1, %c0_i32, %c0_i32_0 : i32, i32, i32
  }
  func.func @transform_5(%arg0: i32, %arg1: i32) -> (i32, i32, i32) {
    %c0_i32 = arith.constant 0 : i32
    %c0_i32_0 = arith.constant 0 : i32
    %c0_i32_1 = arith.constant 0 : i32
    return %arg1, %c0_i32, %c0_i32_0 : i32, i32, i32
  }
  func.func @transform_6(%arg0: i32, %arg1: i32) -> (i32, i32, i32) {
    %c0_i32 = arith.constant 0 : i32
    %c0_i32_0 = arith.constant 0 : i32
    %c0_i32_1 = arith.constant 0 : i32
    return %arg1, %c0_i32, %c0_i32_0 : i32, i32, i32
  }
  func.func @transform_7(%arg0: i32, %arg1: i32) -> (i32, i32, i32) {
    %c0_i32 = arith.constant 0 : i32
    %c0_i32_0 = arith.constant 0 : i32
    %c0_i32_1 = arith.constant 0 : i32
    return %arg1, %c0_i32, %c0_i32_0 : i32, i32, i32
  }
  func.func @transform_8(%arg0: i32, %arg1: i32) -> (i32, i32, i32) {
    %c0_i32 = arith.constant 0 : i32
    %c0_i32_0 = arith.constant 0 : i32
    %c0_i32_1 = arith.constant 0 : i32
    return %arg1, %c0_i32, %c0_i32_0 : i32, i32, i32
  }
  func.func @transform_9(%arg0: i32, %arg1: i32) -> (i32, i32, i32) {
    %c0_i32 = arith.constant 0 : i32
    %c0_i32_0 = arith.constant 0 : i32
    %c0_i32_1 = arith.constant 0 : i32
    return %arg1, %c0_i32, %c0_i32_0 : i32, i32, i32
  }
  func.func @transform_10(%arg0: i32, %arg1: i32) -> (i32, i32, i32) {
    %c0_i32 = arith.constant 0 : i32
    %c0_i32_0 = arith.constant 0 : i32
    %c0_i32_1 = arith.constant 0 : i32
    return %arg1, %c0_i32, %c0_i32_0 : i32, i32, i32
  }
  func.func @transform_11(%arg0: i32, %arg1: i32) -> (i32, i32, i32) {
    %c0_i32 = arith.constant 0 : i32
    %c0_i32_0 = arith.constant 0 : i32
    %c0_i32_1 = arith.constant 0 : i32
    return %arg1, %c0_i32, %c0_i32_0 : i32, i32, i32
  }
  func.func @transform_12(%arg0: i32, %arg1: i32) -> (i32, i32) {
    %c0_i32 = arith.constant 0 : i32
    %c0_i32_0 = arith.constant 0 : i32
    %c0_i32_1 = arith.constant 0 : i32
    return %c0_i32, %c0_i32_0 : i32, i32
  }
  func.func @transform_13(%arg0: i32, %arg1: i32) -> (i32, i32) {
    %c0_i32 = arith.constant 0 : i32
    %c0_i32_0 = arith.constant 0 : i32
    %c0_i32_1 = arith.constant 0 : i32
    return %c0_i32, %c0_i32_0 : i32, i32
  }
  func.func @transform_14(%arg0: i32, %arg1: i32) -> (i32, i32, i32) {
    %c0_i32 = arith.constant 0 : i32
    %c0_i32_0 = arith.constant 0 : i32
    %c0_i32_1 = arith.constant 0 : i32
    return %arg0, %c0_i32, %c0_i32_0 : i32, i32, i32
  }
}

</mosaic_0001>

<bundles_post_ra>
// kernel: transformer_encoder_forward.1
= control target key start
LH: loop header
LB: loop body
LE: loop exit
PB: predicated region body
PF: predicated region fallthrough
CT: control target
= control target key end

     0   :  { %s4586_s0 = inlined_call_operand.hbm [shape: f32[2,8,128], index: 0, kind: input, shape index: {}]   ;;  %s4587_s1 = inlined_call_operand.vmem [shape: f32[2,1,128], index: 1, kind: input, shape index: {}]   ;;  %s4588_s2 = inlined_call_operand.hbm [shape: f32[2,1,128], index: 2, kind: input, shape index: {}]   ;;  %s4589_s3 = inlined_call_operand.hbm [shape: bf16[2,128,384], index: 3, kind: input, shape index: {}]   ;;  %s4590_s4 = inlined_call_operand.hbm [shape: bf16[2,128,128], index: 4, kind: input, shape index: {}]   ;;  %s4591_s5 = inlined_call_operand.hbm [shape: f32[2,1,128], index: 5, kind: input, shape index: {}]   ;;  %s4592_s6 = inlined_call_operand.vmem [shape: f32[2,1,128], index: 6, kind: input, shape index: {}]   ;;  %s4593_s7 = inlined_call_operand.hbm [shape: f32[2,1,128], index: 7, kind: input, shape index: {}]   ;;  %s4594_s8 = inlined_call_operand.hbm [shape: bf16[2,128,512], index: 8, kind: input, shape index: {}]   ;;  %s4595_s9 = inlined_call_operand.hbm [shape: f32[2,1,512], index: 9, kind: input, shape index: {}]   ;;  %s4596_s10 = inlined_call_operand.hbm [shape: bf16[2,512,128], index: 10, kind: input, shape index: {}]   ;;  %s4597_s11 = inlined_call_operand.hbm [shape: f32[2,1,128], index: 11, kind: input, shape index: {}]   ;;  %s4598_s12 = inlined_call_operand.vmem [shape: f32[1,128], index: 12, kind: input, shape index: {}]   ;;  %s4599_s13 = inlined_call_operand.vmem [shape: f32[1,128], index: 13, kind: input, shape index: {}]   ;;  %s4600_s14 = inlined_call_operand.hbm [shape: f32[2,8,128], index: 14, kind: output, shape index: {}]  }
   0x1   :  { %4622 = sst [smem:[#allocation45_spill]] %s4586_s0 }
   0x2   :  { %4623 = sst [smem:[#allocation46_spill]] %s4587_s1 }
   0x3   :  { %4624 = sst [smem:[#allocation47_spill]] %s4588_s2 }
   0x4   :  { %4625 = sst [smem:[#allocation48_spill]] %s4589_s3 }
   0x5   :  { %4626 = sst [smem:[#allocation49_spill]] %s4590_s4 }
   0x6   :  { %4627 = sst [smem:[#allocation50_spill]] %s4591_s5 }
   0x7   :  { %4628 = sst [smem:[#allocation51_spill]] %s4592_s6 }
   0x8   :  { %4629 = sst [smem:[#allocation52_spill]] %s4593_s7 }
   0x9   :  { %4630 = sst [smem:[#allocation53_spill]] %s4594_s8 }
   0xa   :  { %4631 = sst [smem:[#allocation54_spill]] %s4595_s9 }
   0xb   :  { %4632 = sst [smem:[#allocation55_spill]] %s4596_s10 }
   0xc   :  { %4633 = sst [smem:[#allocation56_spill]] %s4597_s11 }
   0xd   :  { %4634 = sst [smem:[#allocation57_spill]] %s4598_s12 }
   0xe   :  { %4635 = sst [smem:[#allocation58_spill]] %s4599_s13 }
   0xf   :  { %4636 = sst [smem:[#allocation59_spill]] %s4600_s14 }
  0x10   :  { %19 = vsyncpa [#allocation8], 0 }
  0x11   :  { %21 = vsyncpa [#allocation8 + $0x1], 0 }
  0x12   :  { %22 = vsyncpa [#allocation11], 0 }
  0x13   :  { %24 = vsyncpa [#allocation11 + $0x1], 0 }
  0x14   :  { %25 = vsyncpa [#allocation14], 0 }
  0x15   :  { %27 = vsyncpa [#allocation14 + $0x1], 0 }
  0x16   :  { %28 = vsyncpa [#allocation17], 0 }
  0x17   :  { %30 = vsyncpa [#allocation17 + $0x1], 0 }
  0x18   :  { %31 = vsyncpa [#allocation20], 0 }
  0x19   :  { %33 = vsyncpa [#allocation20 + $0x1], 0 }
  0x1a   :  { %34 = vsyncpa [#allocation23], 0 }
  0x1b   :  { %36 = vsyncpa [#allocation23 + $0x1], 0 }
  0x1c   :  { %37 = vsyncpa [#allocation9], 0 }
  0x1d   :  { %39 = vsyncpa [#allocation9 + $0x1], 0  ;;  %s3838_s29 = smov 0   ;;  %s3840_s30 = smov 0  }
  0x1e   :  { %s3842_s15 = smov 0   ;;  %s3844_s16 = smov 0  }
  0x1f   :  { %s3846_s17 = smov 0   ;;  %s3848_s18 = smov 0  }
  0x20   :  { %s3850_s19 = smov 0   ;;  %s3852_s20 = smov 0  }
  0x21   :  { %s3854_s21 = smov 0   ;;  %s3856_s22 = smov 0  }
  0x22   :  { %s3858_s23 = smov 0  }
  0x23 LB: > { %4637 = sst [smem:[#allocation32_spill]] %s3719_s15  ;;  %p72_p0 = scmp.eq.s32.totalorder %s3751_s23, 0  ;;  %s3751_s23 = sphi %s3858_s23, %s45_s23   ;;  %s3747_s22 = sphi %s3856_s22, %s4697_s22   ;;  %s3743_s21 = sphi %s3854_s21, %s4703_s21   ;;  %s3739_s20 = sphi %s3852_s20, %s4695_s20   ;;  %s3735_s19 = sphi %s3850_s19, %s4702_s19   ;;  %s3731_s18 = sphi %s3848_s18, %s4694_s18   ;;  %s3727_s17 = sphi %s3846_s17, %s4701_s17   ;;  %s3723_s16 = sphi %s3844_s16, %s4700_s16   ;;  %s3719_s15 = sphi %s3842_s15, %s4692_s15   ;;  %s3715_s30 = sphi %s3840_s30, %s4699_s30   ;;  %s3711_s29 = sphi %s3838_s29, %s4698_s29  }
  0x24   : > { %4638 = sst [smem:[#allocation33_spill]] %s3723_s16  ;;  %p123_p1 = scmp.ne.s32.totalorder %s3719_s15, %s3715_s30 }
  0x25   : > { %4639 = sst [smem:[#allocation34_spill]] %s3731_s18  ;;  %p4609_p2 = scmp.lt.s32.totalorder %s3751_s23, 4 }
  0x26   : > { %4640 = sst [smem:[#allocation35_spill]] %s3735_s19  ;;  %p125_p3 = por %p123_p1, %p72_p0 }
  0x27   : > { %4641 = sst [smem:[#allocation36_spill]] %s3739_s20  ;;  %s3900_s24 = sand.u32 1, %s3751_s23  }
  0x28   : > { %4642 = sst [smem:[#allocation37_spill]] %s3747_s22  ;;  %s3903_s25 = sand.u32 1, %s3719_s15  }
  0x29   : > { %4643 = sst [smem:[#allocation38_spill]] %s3751_s23  ;;  %s489_s20 = scalar_lea.vmem [#allocation10], %s3903_s25 }
  0x2a   : > { %s4644_s2 = sld [smem:[#allocation47_spill]]  ;;  %s496_s13 = sshll.u32 %s489_s20, 4  ;;  %s497_s13 = int_to_ptr.vmem [resolvable:$true] %s496_s13 }
  0x2b   : > { %p3912_p4 = pnand %p4609_p2, %p125_p3  ;;  %p2601_p5 = scmp.ge.s32.totalorder %s3751_s23, 1 }
  0x2c   : > { %p665_p6 = scmp.lt.s32.totalorder %s3751_s23, 5  ;;  %s2590_s26 = sshll.u32 %s3903_s25, 6 }
  0x2d   : > { %s4603_s27 = scalar_lea.sflag [#allocation11], %s3900_s24  ;;  %s4647_s4 = sld [smem:[#allocation49_spill]] }
  0x2e   : > { %p3924_p7 = pnand %p2601_p5, %p665_p6  ;;  %s4648_s7 = sld [smem:[#allocation52_spill]] }
  0x2f   : > { %s573_s19 = scalar_lea.vmem [#allocation16], %s3903_s25  ;;  %s4649_s9 = sld [smem:[#allocation54_spill]] }
  0x30   : > { %s492_s28 = scalar_lea.hbm %s4644_s2, %s3743_s21  ;;  %s529_s2 = scalar_lea.vmem [#allocation13], %s2590_s26 }
  0x31   : > { %s494_s14 = sshll.u32 %s492_s28, 4  ;;  %s3010_s28 = sshll.u32 %s3743_s21, 6  ;;  %s495_s14 = int_to_ptr.hbm [resolvable:$true] %s494_s14 }
  0x32   : > { %3140 = dma.hbm_to_vmem [thread:$0]  (!%p3912_p4), %s495_s14, 16, %s497_s13, %s4603_s27  }
  0x33   : > { %s537_s6 = sshll.u32 %s529_s2, 4  ;;  %s534_s11 = scalar_lea.hbm %s4647_s4, %s3010_s28  ;;  %s538_s6 = int_to_ptr.vmem [resolvable:$true] %s537_s6 }
  0x34   : > { %s535_s10 = sshll.u32 %s534_s11, 4  ;;  %s4608_s13 = scalar_lea.sflag [#allocation14], %s3900_s24  ;;  %s536_s10 = int_to_ptr.hbm [resolvable:$true] %s535_s10 }
  0x35   : > { %s4604_s14 = smov 64   ;;  %s4605_s27 = smov 4  }
  0x36   : > { %3146 = dma.hbm_to_vmem [thread:$0]  (!%p3912_p4), %s536_s10, 1024, %s538_s6, %s4608_s13, %s4604_s14, %s4604_s14, %s4605_s27  }
  0x37   : > { %s576_s1 = scalar_lea.hbm %s4648_s7, %s3743_s21  ;;  %s580_s28 = sshll.u32 %s573_s19, 4  ;;  %s581_s28 = int_to_ptr.vmem [resolvable:$true] %s580_s28 }
  0x38   : > { %s578_s11 = sshll.u32 %s576_s1, 4  ;;  %s4607_s4 = scalar_lea.sflag [#allocation17], %s3900_s24  ;;  %s579_s11 = int_to_ptr.hbm [resolvable:$true] %s578_s11 }
  0x39   : > { %3152 = dma.hbm_to_vmem [thread:$0]  (!%p3912_p4), %s579_s11, 16, %s581_s28, %s4607_s4  }
  0x3a   : > { %s2596_s6 = sshll.u32 %s3903_s25, 2  ;;  %s2597_s10 = sshll.u32 %s3743_s21, 2 }
  0x3b   : > { %s617_s1 = scalar_lea.hbm %s4649_s9, %s2597_s10  ;;  %s613_s14 = scalar_lea.vmem [#allocation19], %s2596_s6 }
  0x3c   : > { %s619_s19 = sshll.u32 %s617_s1, 4  ;;  %s621_s27 = sshll.u32 %s613_s14, 4  ;;  %s620_s19 = int_to_ptr.hbm [resolvable:$true] %s619_s19  ;;  %s622_s27 = int_to_ptr.vmem [resolvable:$true] %s621_s27 }
  0x3d   : > { %s4606_s28 = scalar_lea.sflag [#allocation20], %s3900_s24  ;;  %s3961_s11 = sadd.s32 4294967295, %s3751_s23  }
  0x3e   : > { %3158 = dma.hbm_to_vmem [thread:$0]  (!%p3912_p4), %s620_s19, 64, %s622_s27, %s4606_s28  }
  0x3f   : > { %s2584_s10 = sadd.s32 4294967294, %s3751_s23   ;;  %s54_s2 = sadd.s32 1, %s3743_s21 }
  0x40   : > { %s57_s6 = sadd.s32 1, %s3747_s22  ;;  %p55_p8 = scmp.ge.s32.totalorder %s54_s2, 2 }
  0x41   : > { %s64_s14 = sadd.s32 1, %s3731_s18  ;;  %p71_p9 = scmp.ne.s32.totalorder %s3731_s18, %s3727_s17 }
  0x42   : > { %p77_p10 = scmp.ne.s32.totalorder %s3727_s17, %s3723_s16  ;;  %s4705_s2 = smov (%p55_p8, %s54_s2), 0 }
  0x43   : > { %4650 = sst [smem:[#allocation39_spill]] %s4705_s2  ;;  %s4707_s6 = smov (!%p55_p8, %s57_s6), %s3747_s22 }
  0x44   : > { %p3979_p11 = por %p72_p0, %p71_p9  ;;  %p78_p12 = scmp.eq.s32.totalorder %s3961_s11, 0 }
  0x45   : > { %p59_p13 = scmp.ge.s32.totalorder %s4707_s6, 2  ;;  %s113_s26 = ssub.s32 %s3743_s21, %s4705_s2 }
  0x46   : > { %p3989_p1 = por %p78_p12, %p77_p10  ;;  %p114_p3 = scmp.eq.s32.totalorder %s113_s26, 0 }
  0x47   : > { %s4709_s6 = smov (%p59_p13, %s4707_s6), 0  ;;  %s116_s19 = sadd.s32 1, %s3719_s15 }
  0x48   : > { %s4652_s1 = scalar_select %p3989_p1, 1, 0 }
  0x49   : > { %4653 = sst [smem:[#allocation40_spill]] %s4709_s6  ;;  %p129_p0 = scmp.ne.s32.totalorder %s3715_s30, %s3711_s29 }
  0x4a   : > { %s61_s28 = ssub.s32 %s3747_s22, %s4709_s6  ;;  %p429_p5 = scmp.eq.s32.totalorder %s3961_s11, 3 }
  0x4b   : > { %p62_p6 = scmp.eq.s32.totalorder %s61_s28, 0  ;;  %p4001_p8 = por %p129_p0, %p78_p12 }
  0x4c   : > { %s4006_s13 = scalar_select %p114_p3, %s3719_s15, %s116_s19  }
  0x4d   : > { %s4009_s7 = scalar_select %p62_p6, %s3731_s18, %s64_s14  }
  0x4e   : > { %4655 = sst [smem:[#allocation41_spill]] %s4006_s13  ;;  %p4014_p13 = por %p429_p5, %p71_p9 }
  0x4f   : > { %4656 = sst [smem:[#allocation42_spill]] %s4009_s7  ;;  %p435_p2 = scmp.eq.s32.totalorder %s2584_s10, 3 }
  0x50   : > { %s4657_s26 = scalar_select %p4014_p13, 1, 0 }
  0x51   : > { %s461_s29 = sand.u32 1, %s3731_s18   ;;  %s2588_s28 = sshll.u32 %s3747_s22, 3 }
  0x52   : > { %4658 = sst [smem:[#allocation43_spill]] %s4657_s26  ;;  %p4023_p1 = por %p435_p2, %p77_p10 }
  0x53   : > { %s2587_s6 = sshll.u32 %s461_s29, 3  ;;  %s4661_s0 = sld [smem:[#allocation45_spill]] }
  0x54   : > { %s4659_s9 = scalar_select %p4023_p1, 1, 0 }
  0x55   : > { %s465_s7 = scalar_lea.vmem [#allocation7], %s2587_s6  ;;  %p4662_p9 = scmp.lt.s32.totalorder %s3751_s23, 4 }
  0x56   : > { %4660 = sst [smem:[#allocation44_spill]] %s4659_s9  ;;  %s473_s15 = sshll.u32 %s465_s7, 4  ;;  %s474_s15 = int_to_ptr.vmem [resolvable:$true] %s473_s15 }
  0x57   : > { %p3135_p2 = pnand %p4662_p9, %p3979_p11  ;;  %s3109_s10 = smul.u32 192, %s3903_s25 }
  0x58   : > { %s3110_s22 = smul.u32 192, %s3743_s21  ;;  %s462_s18 = scalar_lea.sflag [#allocation8], %s461_s29 }
  0x59   : > { %s469_s13 = scalar_lea.hbm %s4661_s0, %s2588_s28  ;;  %s4663_s3 = sld [smem:[#allocation48_spill]] }
  0x5a   : > { %s471_s14 = sshll.u32 %s469_s13, 4  ;;  %s507_s7 = scalar_lea.vmem [#allocation12], %s3109_s10  ;;  %s472_s14 = int_to_ptr.hbm [resolvable:$true] %s471_s14 }
  0x5b   : > { %3137 = dma.hbm_to_vmem [thread:$0]  (!%p3135_p2), %s472_s14, 128, %s474_s15, %s462_s18  }
  0x5c   : > { %s515_s6 = sshll.u32 %s507_s7, 4  ;;  %s3755_s27 = smov 192   ;;  %s516_s6 = int_to_ptr.vmem [resolvable:$true] %s515_s6 }
  0x5d   : > { %s3756_s28 = smov 12   ;;  %s4664_s19 = scalar_lea.sflag [#allocation11], %s3900_s24 }
  0x5e   : > { %s4665_s5 = sld [smem:[#allocation50_spill]]  ;;  %s550_s9 = scalar_lea.vmem [#allocation15], %s3903_s25 }
  0x5f   : > { %s512_s13 = scalar_lea.hbm %s4663_s3, %s3110_s22  ;;  %s557_s16 = sshll.u32 %s550_s9, 4  ;;  %s558_s16 = int_to_ptr.vmem [resolvable:$true] %s557_s16 }
  0x60   : > { %s513_s2 = sshll.u32 %s512_s13, 4  ;;  %s2593_s14 = sshll.u32 %s3903_s25, 8  ;;  %s514_s2 = int_to_ptr.hbm [resolvable:$true] %s513_s2 }
  0x61   : > { %3143 = dma.hbm_to_vmem [thread:$0]  (!%p3912_p4), %s514_s2, 3072, %s516_s6, %s4664_s19, %s3755_s27, %s3755_s27, %s3756_s28  }
  0x62   : > { %s4666_s10 = scalar_lea.sflag [#allocation14], %s3900_s24  ;;  %s3011_s13 = sshll.u32 %s3743_s21, 8 }
  0x63   : > { %s4667_s8 = sld [smem:[#allocation53_spill]]  ;;  %s591_s6 = scalar_lea.vmem [#allocation18], %s2593_s14 }
  0x64   : > { %s553_s18 = scalar_lea.hbm %s4665_s5, %s3743_s21  ;;  %s599_s27 = sshll.u32 %s591_s6, 4  ;;  %s600_s27 = int_to_ptr.vmem [resolvable:$true] %s599_s27 }
  0x65   : > { %s555_s22 = sshll.u32 %s553_s18, 4  ;;  %s3757_s19 = smov 256   ;;  %s556_s22 = int_to_ptr.hbm [resolvable:$true] %s555_s22 }
  0x66   : > { %3149 = dma.hbm_to_vmem [thread:$0]  (!%p3912_p4), %s556_s22, 16, %s558_s16, %s4666_s10  }
  0x67   : > { %s3758_s29 = smov 16   ;;  %s4668_s15 = scalar_lea.sflag [#allocation17], %s3900_s24 }
  0x68   : > { %s4669_s0 = sld [smem:[#allocation55_spill]]  ;;  %s632_s22 = scalar_lea.vmem [#allocation21], %s2593_s14 }
  0x69   : > { %s596_s2 = scalar_lea.hbm %s4667_s8, %s3011_s13  ;;  %s640_s10 = sshll.u32 %s632_s22, 4  ;;  %s641_s10 = int_to_ptr.vmem [resolvable:$true] %s640_s10 }
  0x6a   : > { %s597_s28 = sshll.u32 %s596_s2, 4  ;;  %s4670_s2 = smov 4   ;;  %s598_s28 = int_to_ptr.hbm [resolvable:$true] %s597_s28 }
  0x6b   : > { %3155 = dma.hbm_to_vmem [thread:$0]  (!%p3912_p4), %s598_s28, 4096, %s600_s27, %s4668_s15, %s3757_s19, %s3757_s19, %s3758_s29  }
  0x6c   : > { %s4671_s6 = smov 64   ;;  %s4672_s3 = scalar_lea.sflag [#allocation20], %s3900_s24 }
  0x6d   : > { %s4673_s23 = sld [smem:[#allocation56_spill]]  ;;  %s653_s28 = scalar_lea.vmem [#allocation22], %s3903_s25 }
  0x6e   : > { %s637_s16 = scalar_lea.hbm %s4669_s0, %s3011_s13  ;;  %s660_s19 = sshll.u32 %s653_s28, 4  ;;  %s661_s19 = int_to_ptr.vmem [resolvable:$true] %s660_s19 }
  0x6f   : > { %s638_s7 = sshll.u32 %s637_s16, 4  ;;  %s651_s14 = scalar_lea.sflag [#allocation23], %s3903_s25  ;;  %s639_s7 = int_to_ptr.hbm [resolvable:$true] %s638_s7 }
  0x70   : > { %3161 = dma.hbm_to_vmem [thread:$0]  (!%p3912_p4), %s639_s7, 4096, %s641_s10, %s4672_s3, %s4671_s6, %s4671_s6, %s4670_s2  }
  0x71   : > { %669 = sbr.rel (%p3924_p7) target bundleno = 2368 (0x940), region = 76  ;;  %s4082_s13 = sand.u32 (!%p3924_p7), 1, %s3727_s17  }
  0x72   : > { %s2602_s3 = sshll.u32 (!%p3924_p7), %s4082_s13, 3  ;;  %s672_s5 = scalar_lea.sflag (!%p3924_p7), [#allocation8], %s4082_s13 }
  0x73   : > { %s656_s26 = scalar_lea.hbm %s4673_s23, %s3743_s21  ;;  %s4088_s8 = scalar_lea.vmem (!%p3924_p7), [#allocation7], %s2602_s3 }
  0x74   : > { %s658_s27 = sshll.u32 %s656_s26, 4  ;;  %p4674_p10 = scmp.ne.s32.totalorder (!%p3924_p7), %s4652_s1, 0  ;;  %s659_s27 = int_to_ptr.hbm [resolvable:$true] %s658_s27 }
  0x75   : > { %3164 = dma.hbm_to_vmem [thread:$0]  (!%p3912_p4), %s659_s27, 16, %s661_s19, %s651_s14  }
  0x76   : > { %3682 = dma.done.wait (%p4674_p10), %s672_s5, 128  }
  0x77   : > { %3684 = vsyncadd (%p4674_p10), %s672_s5, 4294967168  ;;  %s681_s12 = sand.u32 1, %s3961_s11   ;;  %s4096_s23 = sand.u32 1, %s3715_s30  }
  0x78   : > { %s682_s24 = scalar_lea.sflag [#allocation11], %s681_s12  ;;  %s684_s25 = scalar_lea.vmem [#allocation10], %s4096_s23 }
  0x79   : > { %3686 = dma.done.wait (%p4001_p8), %s682_s24, 3088  }
  0x7a   : > { %3688 = vsyncadd (%p4001_p8), %s682_s24, 4294964208  ;;  %s3111_s20 = smul.u32 192, %s4096_s23  ;;  %s2603_s1 = sshll.u32 %s4096_s23, 6 }
  0x7b   : > { %s701_s29 = scalar_lea.sflag [#allocation14], %s681_s12  ;;  %s4107_s15 = scalar_lea.vmem [#allocation13], %s2603_s1 }
  0x7c   : > { %s4105_s26 = scalar_lea.vmem [#allocation12], %s3111_s20 }
  0x7d   : > { %3690 = dma.done.wait (%p4001_p8), %s701_s29, 1040  }
  0x7e   : > { %3692 = vsyncadd (%p4001_p8), %s701_s29, 4294966256  ;;  %s713_s11 = scalar_lea.vmem [#allocation15], %s4096_s23  ;;  %s720_s18 = scalar_lea.sflag [#allocation17], %s681_s12 }
  0x7f   : > { %s722_s9 = scalar_lea.vmem [#allocation16], %s4096_s23 }
  0x80   : > { %3694 = dma.done.wait (%p4001_p8), %s720_s18, 4112  }
  0x81   : > { %3696 = vsyncadd (%p4001_p8), %s720_s18, 4294963184  ;;  %s2604_s0 = sshll.u32 %s4096_s23, 8  ;;  %s2605_s16 = sshll.u32 %s4096_s23, 2 }
  0x82   : > { %s4121_s22 = scalar_lea.vmem [#allocation18], %s2604_s0  ;;  %s739_s10 = scalar_lea.sflag [#allocation20], %s681_s12 }
  0x83   : > { %s4123_s7 = scalar_lea.vmem [#allocation19], %s2605_s16 }
  0x84   : > { %3698 = dma.done.wait (%p4001_p8), %s739_s10, 4160  }
  0x85   : > { %3700 = vsyncadd (%p4001_p8), %s739_s10, 4294963136  ;;  %s4129_s2 = scalar_lea.vmem [#allocation21], %s2604_s0  ;;  %s759_s6 = scalar_lea.sflag [#allocation23], %s4096_s23 }
  0x86   : > { %s761_s27 = scalar_lea.vmem [#allocation22], %s4096_s23 }
  0x87   : > { %3702 = dma.done.wait (%p4001_p8), %s759_s6, 16  }
  0x88   : > { %3704 = vsyncadd (%p4001_p8), %s759_s6, 4294967280  ;;  %s4675_s28 = sld [smem:[#allocation35_spill]]  ;;  %s4151_s0 = scalar_lea.vmem [#allocation24], %s2602_s3 }
  0x89   : > { %s4676_s12 = sld [smem:[#allocation46_spill]] }
  0x8a   : > { %s4677_s29 = sld [smem:[#allocation51_spill]] }
  0x8e   : > { %p854_p4 = scmp.lt.s32.totalorder %s4675_s28, 1  ;;  %p2608_p7 = scmp.ne.s32.totalorder %s4675_s28, 0 }
  0x90   : > { %s4139_s19 = scalar_select %p854_p4, %s4675_s28, 1 }
  0x91   : > { %864 = sbr.rel (%p2608_p7) target bundleno = 152 (0x98), region = 120 }
  0x92   : > { %s856_s24 = scalar_lea.vmem %s4676_s12, %s4139_s19  ;;  %s859_s18 = scalar_lea.vmem %s4677_s29, %s4139_s19 }
  0x96   : > { %v865_v0 = vld [vmem:[%s4088_s8] sm:$0xff] }
  0x97   : > { %866 = vst [vmem:[#allocation2] sm:$0xff] %v865_v0 }
  0x98 PF: > { %v3759_v2 = vmov 128.0   ;;  %v2695_v3 = vld [vmem:[%s4105_s26 + $0xa8] sm:$0xf]  ;;  %v3035_v4 = vld [vmem:[%s4105_s26 + $0xb0] sm:$0xf0]  ;;  %vm1107_vm4 = vcmask 257024  }
  0x99   : > { %3275 = vrcp.f32 %v3759_v2  ;;  %v3034_v5 = vld [vmem:[%s4105_s26 + $0xac] sm:$0xf]  ;;  %v2696_v6 = vor.u32 %v3035_v4, %v2695_v3  ;;  %v2697_v7 = vld [vmem:[%s4105_s26 + $0xb4] sm:$0xf0]  ;;  %v2703_v8 = vld [vmem:[%s4105_s26 + $0xb0] sm:$0xf] }
  0x9a   : > { %v3036_v9 = vld [vmem:[%s4105_s26 + $0xb8] sm:$0xf0]  ;;  %v2700_v10 = vor.u32 %v3034_v5, %v2697_v7  ;;  %v2683_v22 = vld [vmem:[%s4105_s26 + $0x90] sm:$0xf]  ;;  %v3031_v24 = vld [vmem:[%s4105_s26 + $0x94] sm:$0xf] }
  0x9b   : > { %v2704_v11 = vor.u32 %v3036_v9, %v2703_v8  ;;  %1066 = vmatpush.bf16.msra.mxu0 %v2696_v6  ;;  %v3032_v23 = vld [vmem:[%s4105_s26 + $0x98] sm:$0xf0]  ;;  %v2685_v26 = vld [vmem:[%s4105_s26 + $0x9c] sm:$0xf0]  ;;  %v2691_v27 = vld [vmem:[%s4105_s26 + $0x98] sm:$0xf] }
  0x9c   : > { %1079 = vmatpush.bf16.msra.mxu1 %v2700_v10  ;;  %v2684_v25 = vor.u32 %v3032_v23, %v2683_v22  ;;  %v3033_v28 = vld [vmem:[%s4105_s26 + $0xa0] sm:$0xf0]  ;;  %v2688_v29 = vor.u32 %v3031_v24, %v2685_v26  ;;  %v2671_v31 = vld [vmem:[%s4105_s26 + $0x78] sm:$0xf]  ;;  %v3028_v33 = vld [vmem:[%s4105_s26 + $0x7c] sm:$0xf] }
  0x9d   : > { %1092 = vmatpush.bf16.msra.mxu2 %v2704_v11  ;;  %v2692_v30 = vor.u32 %v3033_v28, %v2691_v27  ;;  %v3029_v32 = vld [vmem:[%s4105_s26 + $0x80] sm:$0xf0]  ;;  %v2673_v35 = vld [vmem:[%s4105_s26 + $0x84] sm:$0xf0]  ;;  %v2679_v36 = vld [vmem:[%s4105_s26 + $0x80] sm:$0xf] }
  0x9e   : > { %v4155_v1 = vld [vmem:[#allocation2] sm:$0xff]  ;;  %v2672_v34 = vor.u32 %v3029_v32, %v2671_v31  ;;  %v3030_v37 = vld [vmem:[%s4105_s26 + $0x88] sm:$0xf0]  ;;  %v2676_v38 = vor.u32 %v3028_v33, %v2673_v35  ;;  %v2659_v40 = vld [vmem:[%s4105_s26 + $0x60] sm:$0xf]  ;;  %s3761_s16 = smov 96  }
  0x9f   : > { %870 = vadd.xlane.f32.xlu0 %v4155_v1  ;;  %v3276_v12 = vpop.eup %3275  ;;  %1067 = vmatpush.bf16.msra.mxu0 %v2684_v25  ;;  %v2680_v39 = vor.u32 %v3030_v37, %v2679_v36  ;;  %v3026_v41 = vld [vmem:[%s4105_s26 + $0x68] sm:$0xf0]  ;;  %v3025_v42 = vld [vmem:[%s4105_s26 + $0x64] sm:$0xf]  ;;  %v2661_v44 = vld [vmem:[%s4105_s26 + $0x6c] sm:$0xf0] }
  0xa0   : > { %v873_v13 = vmul.f32 128.0, %v3276_v12  ;;  %vm877_vm0 = vweird.f32 %v3276_v12  ;;  %1080 = vmatpush.bf16.msra.mxu1 %v2688_v29  ;;  %v2660_v43 = vor.u32 %v3026_v41, %v2659_v40  ;;  %v2667_v45 = vld [vmem:[%s4105_s26 + $0x68] sm:$0xf]  ;;  %v3027_v46 = vld [vmem:[%s4105_s26 + $0x70] sm:$0xf0]  ;;  %v2664_v47 = vor.u32 %v3025_v42, %v2661_v44 }
  0xa1   : > { %1093 = vmatpush.bf16.msra.mxu2 %v2692_v30  ;;  %v2668_v48 = vor.u32 %v3027_v46, %v2667_v45  ;;  %v2647_v49 = vld [vmem:[%s4105_s26 + $0x48] sm:$0xf]  ;;  %v3023_v50 = vld [vmem:[%s4105_s26 + $0x50] sm:$0xf0]  ;;  %v3022_v51 = vld [vmem:[%s4105_s26 + $0x4c] sm:$0xf] }
  0xa2   : > { %v874_v14 = vsub.f32 1.0, %v873_v13  ;;  %v2648_v52 = vor.u32 %v3023_v50, %v2647_v49  ;;  %v2649_v53 = vld [vmem:[%s4105_s26 + $0x54] sm:$0xf0]  ;;  %v2655_v54 = vld [vmem:[%s4105_s26 + $0x50] sm:$0xf]  ;;  %vm1169_vm5 = vcmask 261120  }
  0xa3   : > { %1068 = vmatpush.bf16.msra.mxu0 %v2672_v34  ;;  %v3024_v55 = vld [vmem:[%s4105_s26 + $0x58] sm:$0xf0]  ;;  %v2652_v56 = vor.u32 %v3022_v51, %v2649_v53  ;;  %v2635_v58 = vld [vmem:[%s4105_s26 + $0x30] sm:$0xf]  ;;  %v3019_v60 = vld [vmem:[%s4105_s26 + $0x34] sm:$0xf] }
  0xa4   : > { %v875_v15 = vmul.f32 %v3276_v12, %v874_v14  ;;  %1081 = vmatpush.bf16.msra.mxu1 %v2676_v38  ;;  %v2656_v57 = vor.u32 %v3024_v55, %v2655_v54  ;;  %v3020_v59 = vld [vmem:[%s4105_s26 + $0x38] sm:$0xf0]  ;;  %v2637_v62 = vld [vmem:[%s4105_s26 + $0x3c] sm:$0xf0]  ;;  %v2643_v63 = vld [vmem:[%s4105_s26 + $0x38] sm:$0xf] }
  0xa5   : > { %1094 = vmatpush.bf16.msra.mxu2 %v2680_v39  ;;  %v2636_v61 = vor.u32 %v3020_v59, %v2635_v58  ;;  %v3021_v0 = vld [vmem:[%s4105_s26 + $0x40] sm:$0xf0]  ;;  %v2640_v2 = vor.u32 %v3019_v60, %v2637_v62  ;;  %v2623_v4 = vld [vmem:[%s4105_s26 + $0x18] sm:$0xf]  ;;  %v3016_v6 = vld [vmem:[%s4105_s26 + $0x1c] sm:$0xf] }
  0xa6   : > { %v876_v16 = vadd.f32 %v3276_v12, %v875_v15  ;;  %v2644_v3 = vor.u32 %v3021_v0, %v2643_v63  ;;  %v3017_v5 = vld [vmem:[%s4105_s26 + $0x20] sm:$0xf0]  ;;  %v2625_v8 = vld [vmem:[%s4105_s26 + $0x24] sm:$0xf0]  ;;  %v2631_v9 = vld [vmem:[%s4105_s26 + $0x20] sm:$0xf] }
  0xa7   : > { %1069 = vmatpush.bf16.msra.mxu0 %v2660_v43  ;;  %v2624_v7 = vor.u32 %v3017_v5, %v2623_v4  ;;  %v3018_v10 = vld [vmem:[%s4105_s26 + $0x28] sm:$0xf0]  ;;  %v2628_v11 = vor.u32 %v3016_v6, %v2625_v8  ;;  %v2611_v13 = vld [vmem:[%s4105_s26] sm:$0xf]  ;;  %v3013_v15 = vld [vmem:[%s4105_s26 + $0x4] sm:$0xf] }
  0xa8   : > { %v4164_v17 = vsel %vm877_vm0, %v3276_v12, %v876_v16  ;;  %1082 = vmatpush.bf16.msra.mxu1 %v2664_v47  ;;  %v2632_v12 = vor.u32 %v3018_v10, %v2631_v9  ;;  %v3014_v14 = vld [vmem:[%s4105_s26 + $0x8] sm:$0xf0]  ;;  %v3269_v33 = vld [vmem:[%s856_s24] ss:$0 sm:$0xff]  ;;  %vm1298_vm6 = vcmask 1043456   ;;  %vm1246_vm7 = vcmask 64512  }
  0xa9   : > { %1095 = vmatpush.bf16.msra.mxu2 %v2668_v48  ;;  %v2612_v16 = vor.u32 %v3014_v14, %v2611_v13  ;;  %v3270_v36 = vld [vmem:[%s684_s25] ss:$0 sm:$0xff]  ;;  %s3762_s25 = smov 64   ;;  %vm1381_vm8 = vcmask 519424   ;;  %vm1387_vm9 = vcmask 781824   ;;  %vm1393_vm10 = vcmask 1044224  }
  0xab   : > { %1070 = vmatpush.bf16.msra.mxu0 %v2648_v52 }
  0xac   : > { %1083 = vmatpush.bf16.msra.mxu1 %v2652_v56 }
  0xad   : > { %1096 = vmatpush.bf16.msra.mxu2 %v2656_v57 }
  0xaf   : > { %1071 = vmatpush.bf16.msra.mxu0 %v2636_v61 }
  0xb0   : > { %1084 = vmatpush.bf16.msra.mxu1 %v2640_v2 }
  0xb1   : > { %1097 = vmatpush.bf16.msra.mxu2 %v2644_v3 }
  0xb3   : > { %1072 = vmatpush.bf16.msra.mxu0 %v2624_v7 }
  0xb4   : > { %1085 = vmatpush.bf16.msra.mxu1 %v2628_v11 }
  0xb5   : > { %1098 = vmatpush.bf16.msra.mxu2 %v2632_v12 }
  0xb7   : > { %1073 = vmatpush.bf16.msra.mxu0 %v2612_v16 }
 0x112   : > { %v871_v18 = vpop.xlane.xlu0 %870 }
 0x113   : > { %v879_v19 = vmul.f32 %v4164_v17, %v871_v18  ;;  %v2613_v18 = vld [vmem:[%s4105_s26 + $0xc] sm:$0xf0] }
 0x114   : > { %v2616_v22 = vor.u32 %v3013_v15, %v2613_v18 }
 0x115   : > { %v4168_v20 = vsub.f32 %v4155_v1, %v879_v19  ;;  %v2619_v19 = vld [vmem:[%s4105_s26 + $0x8] sm:$0xf] }
 0x116   : > { %1086 = vmatpush.bf16.msra.mxu1 %v2616_v22 }
 0x117   : > { %v881_v21 = vmul.f32 %v4168_v20, %v4168_v20 }
 0x119   : > { %882 = vadd.xlane.f32.xlu0 %v881_v21  ;;  %v3015_v21 = vld [vmem:[%s4105_s26 + $0x10] sm:$0xf0]  ;;  %s3760_s26 = smov 32  }
 0x11a   : > { %v2620_v23 = vor.u32 %v3015_v21, %v2619_v19 }
 0x11c   : > { %1099 = vmatpush.bf16.msra.mxu2 %v2620_v23 }
 0x18c   : > { %v883_v24 = vpop.xlane.xlu0 %882 }
 0x18d   : > { %v884_v25 = vmul.f32 %v883_v24, %v4164_v17 }
 0x18f   : > { %v885_v26 = vadd.f32 1e-05, %v884_v25 }
 0x191   : > { %3277 = vrsqrt.f32 %v885_v26  ;;  %vm892_vm2 = vweird.f32 %v885_v26 }
 0x197   : > { %v3278_v27 = vpop.eup %3277 }
 0x198   : > { %v887_v28 = vmul.f32 %v3278_v27, %v885_v26  ;;  %vm893_vm1 = vweird.f32 %v3278_v27 }
 0x199   : > { %vm894_vm3 = vmor %vm892_vm2, %vm893_vm1 }
 0x19a   : > { %v888_v29 = vmul.f32 %v3278_v27, %v887_v28 }
 0x19c   : > { %v889_v30 = vmul.f32 0.5, %v888_v29 }
 0x19e   : > { %v890_v31 = vsub.f32 1.5, %v889_v30 }
 0x1a0   : > { %v891_v32 = vmul.f32 %v3278_v27, %v890_v31 }
 0x1a2   : > { %v895_v34 = vsel %vm894_vm3, %v3278_v27, %v891_v32 }
 0x1a3   : > { %v896_v35 = vmul.f32 %v895_v34, %v4168_v20 }
 0x1a5   : > { %v900_v37 = vmul.f32 %v3269_v33, %v896_v35 }
 0x1a7   : > { %v904_v38 = vadd.f32 %v3270_v36, %v900_v37 }
 0x1a9   : > { %v905_v39 = vpack.c.bf16 %v904_v38, %v904_v38 }
 0x1ab   : > { %1074 = vmatmul.bf16.vlgmr.msra.gmra.mxu0 %v905_v39  ;;  %1087 = vmatmul.bf16.vlgmr.msra.gmra.mxu1 %v905_v39 }
 0x1ac   : > { %1100 = vmatmul.bf16.vlgmr.msra.gmra.mxu2 %v905_v39 }
 0x228   : > { %v1075_v40 = vpop.f32.mrf.mxu0  ;;  %v1088_v41 = vpop.f32.mrf.mxu1 }
 0x229   : > { %v1105_v42 = vpack.c.bf16 %v1088_v41, %v1075_v40 }
 0x22b   : > { %1108 = vst.msk [vmem:[#allocation3] sm:$0xf] %vm1107_vm4, %v1105_v42  ;;  %v1110_v43 = vrot.slane %v1105_v42, 4  ;;  %1143 = vrot.lane.b32.xlu2 %v1105_v42, %s3760_s26  ;;  %1114 = vrot.lane.b32.xlu1 %v1105_v42, %s3761_s16 }
 0x22d   : > { %1112 = vst.msk [vmem:[#allocation4] sm:$0xf] %vm1107_vm4, %v1110_v43 }
 0x22f   : > { %v1101_v20 = vpop.f32.mrf.mxu2 }
 0x230   : > { %v4227_v44 = vpack.c.bf16 %v1101_v20, %v1101_v20  ;;  %v1077_v45 = vpop.f32.mrf.mxu0  ;;  %v1090_v46 = vpop.f32.mrf.mxu1 }
 0x232   : > { %1113 = vst.msk [vmem:[#allocation5] sm:$0xf] %vm1107_vm4, %v4227_v44  ;;  %v1157_v52 = vld [vmem:[#allocation3] sm:$0xf] }
 0x233   : > { %1129 = vrot.lane.b32.xlu1 %v1105_v42, %s3762_s25 }
 0x234   : > { %v1161_v47 = vld [vmem:[#allocation4] sm:$0xf] }
 0x235   : > { %v1174_v48 = vsel %vm1169_vm5, %v1161_v47, 0 }
 0x236   : > { %1183 = vmatpush.bf16.xpose.msra.mxu3 %v1174_v48 }
 0x237   : > { %v1103_v49 = vpop.f32.mrf.mxu2 }
 0x239   : > { %v1165_v50 = vld [vmem:[#allocation5] sm:$0xf] }
 0x23a   : > { %v1300_v51 = vsel %vm1298_vm6, %v1165_v50, 0 }
 0x23b   : > { %1309 = vmatpush.bf16.msrb.mxu2 %v1300_v51 }
 0x23d   : > { %2705 = vmatmul.msk.bf16.vlgmr.msra.gmra.mxu3 %vm1169_vm5, %v1157_v52 }
 0x285   : > { %v1144_v53 = vpop.permute.xlu2 %1143 }
 0x286   : > { %1147 = vst.msk [vmem:[#allocation3 + $0xc] sm:$0xf] %vm1107_vm4, %v1144_v53  ;;  %v1148_v54 = vrot.slane %v1144_v53, 4 }
 0x288   : > { %1151 = vst.msk [vmem:[#allocation4 + $0xc] sm:$0xf] %vm1107_vm4, %v1148_v54 }
 0x28d   : > { %v1160_v57 = vld [vmem:[#allocation3 + $0xc] sm:$0xf] }
 0x28f   : > { %v1164_v55 = vld [vmem:[#allocation4 + $0xc] sm:$0xf] }
 0x290   : > { %v1231_v56 = vsel %vm1169_vm5, %v1164_v55, 0 }
 0x291   : > { %1240 = vmatpush.bf16.xpose.msrb.mxu0 %v1231_v56 }
 0x298   : > { %2708 = vmatmul.msk.bf16.vlgmr.msrb.gmra.mxu0 %vm1169_vm5, %v1160_v57 }
 0x29d   : > { %v1115_v58 = vpop.permute.xlu1 %1114 }
 0x29e   : > { %1118 = vst.msk [vmem:[#allocation3 + $0x4] sm:$0xf] %vm1107_vm4, %v1115_v58  ;;  %v1119_v59 = vrot.slane %v1115_v58, 4 }
 0x2a0   : > { %1122 = vst.msk [vmem:[#allocation4 + $0x4] sm:$0xf] %vm1107_vm4, %v1119_v59 }
 0x2a5   : > { %v1130_v60 = vpop.permute.xlu1 %1129  ;;  %v1158_v0 = vld [vmem:[#allocation3 + $0x4] sm:$0xf] }
 0x2a6   : > { %1133 = vst.msk [vmem:[#allocation3 + $0x8] sm:$0xf] %vm1107_vm4, %v1130_v60  ;;  %v1134_v61 = vrot.slane %v1130_v60, 4 }
 0x2a7   : > { %v1162_v62 = vld [vmem:[#allocation4 + $0x4] sm:$0xf] }
 0x2a8   : > { %1137 = vst.msk [vmem:[#allocation4 + $0x8] sm:$0xf] %vm1107_vm4, %v1134_v61  ;;  %v1193_v63 = vsel %vm1169_vm5, %v1162_v62, 0 }
 0x2a9   : > { %1202 = vmatpush.bf16.xpose.msrb.mxu3 %v1193_v63 }
 0x2ad   : > { %v1159_v4 = vld [vmem:[#allocation3 + $0x8] sm:$0xf] }
 0x2af   : > { %v1163_v2 = vld [vmem:[#allocation4 + $0x8] sm:$0xf] }
 0x2b0   : > { %2706 = vmatmul.msk.bf16.vlgmr.msrb.gmra.mxu3 %vm1169_vm5, %v1158_v0  ;;  %v1212_v3 = vsel %vm1169_vm5, %v1163_v2, 0 }
 0x2b1   : > { %1221 = vmatpush.bf16.xpose.msra.mxu3 %v1212_v3  ;;  %v3044_v3 = vld [vmem:[%s4107_s15 + $0x38] sm:$0xff] }
 0x2b2   : > { %1460 = vmatpush.bf16.msrb.mxu1 %v3044_v3  ;;  %v3066_v3 = vld [vmem:[%s4121_s22 + $0xac] sm:$0xf] }
 0x2c0   : > { %v1185_v5 = vpop.f32.mrf.mxu3  ;;  %2707 = vmatmul.msk.bf16.vlgmr.msra.gmra.mxu3 %vm1169_vm5, %v1159_v4  ;;  %v3043_v4 = vld [vmem:[%s4107_s15 + $0x30] sm:$0xff] }
 0x2c1   : > { %v1247_v6 = vsel %vm1246_vm7, %v1185_v5, -inf  ;;  %1461 = vmatpush.bf16.msrb.mxu1 %v3043_v4  ;;  %v2837_v4 = vld [vmem:[%s4121_s22 + $0xb8] sm:$0xf0] }
 0x2c2   : > { %1248 = vmax.xlane.f32.xlu2 %v1247_v6 }
 0x2c8   : > { %v1187_v7 = vpop.f32.mrf.mxu3 }
 0x315   : > { %v1242_v8 = vpop.f32.mrf.mxu0 }
 0x316   : > { %v1256_v16 = vsel %vm1246_vm7, %v1242_v8, -inf }
 0x31d   : > { %v1244_v9 = vpop.f32.mrf.mxu0 }
 0x333   : > { %v1204_v10 = vpop.f32.mrf.mxu3 }
 0x334   : > { %v1250_v11 = vsel %vm1246_vm7, %v1204_v10, -inf }
 0x335   : > { %v1249_v12 = vpop.xlane.xlu2 %1248  ;;  %1251 = vmax.xlane.f32.xlu0 %v1250_v11 }
 0x336   : > { %v1259_v13 = vsub.f32 %v1185_v5, %v1249_v12 }
 0x338   : > { %v1263_v14 = vmul.f32 1.442695, %v1259_v13 }
 0x33a   : > { %3279 = vpow2.f32 %v1263_v14  ;;  %v3042_v14 = vld [vmem:[%s4107_s15 + $0x28] sm:$0xff] }
 0x33b   : > { %v1206_v15 = vpop.f32.mrf.mxu3  ;;  %1462 = vmatpush.bf16.msrb.mxu1 %v3042_v14 }
 0x33c   : > { %v3041_v15 = vld [vmem:[%s4107_s15 + $0x20] sm:$0xff] }
 0x33d   : > { %1257 = vmax.xlane.f32.xlu0 %v1256_v16  ;;  %v3040_v16 = vld [vmem:[%s4107_s15 + $0x18] sm:$0xff] }
 0x33f   : > { %1463 = vmatpush.bf16.msrb.mxu1 %v3041_v15  ;;  %v3062_v15 = vld [vmem:[%s4121_s22 + $0x8c] sm:$0xf] }
 0x340   : > { %v3280_v18 = vpop.eup %3279 }
 0x341   : > { %v1271_v22 = vsel %vm1246_vm7, %v3280_v18, 0.0 }
 0x343   : > { %v1223_v19 = vpop.f32.mrf.mxu3  ;;  %1464 = vmatpush.bf16.msrb.mxu1 %v3040_v16  ;;  %v2821_v16 = vld [vmem:[%s4121_s22 + $0x98] sm:$0xf0] }
 0x344   : > { %v1253_v21 = vsel %vm1246_vm7, %v1223_v19, -inf }
 0x345   : > { %1254 = vmax.xlane.f32.xlu1 %v1253_v21  ;;  %1272 = vadd.xlane.f32.xlu0 %v1271_v22  ;;  %v3037_v21 = vld [vmem:[%s4107_s15] sm:$0xff] }
 0x34b   : > { %v1225_v23 = vpop.f32.mrf.mxu3 }
 0x359   : > { %1124 = vrot.lane.b32.xlu0 %v4227_v44, %s3761_s16 }
 0x361   : > { %1152 = vrot.lane.b32.xlu0 %v4227_v44, %s3760_s26 }
 0x3a8   : > { %v1252_v24 = vpop.xlane.xlu0 %1251 }
 0x3a9   : > { %v1260_v25 = vsub.f32 %v1204_v10, %v1252_v24 }
 0x3ab   : > { %v1265_v26 = vmul.f32 1.442695, %v1260_v25 }
 0x3ad   : > { %3281 = vpow2.f32 %v1265_v26  ;;  %v3271_v26 = vld [vmem:[%s713_s11] ss:$0 sm:$0xff] }
 0x3b0   : > { %v1258_v27 = vpop.xlane.xlu0 %1257 }
 0x3b1   : > { %v1262_v33 = vsub.f32 %v1242_v8, %v1258_v27 }
 0x3b3   : > { %v3282_v28 = vpop.eup %3281  ;;  %v1269_v36 = vmul.f32 1.442695, %v1262_v33  ;;  %v3073_v33 = vld [vmem:[%s4121_s22 + $0xe4] sm:$0xf] }
 0x3b4   : > { %v1274_v29 = vsel %vm1246_vm7, %v3282_v28, 0.0 }
 0x3b5   : > { %1275 = vadd.xlane.f32.xlu2 %v1274_v29 }
 0x3b8   : > { %v1255_v30 = vpop.xlane.xlu1 %1254  ;;  %v1273_v31 = vpop.xlane.xlu0 %1272 }
 0x3b9   : > { %v1261_v32 = vsub.f32 %v1223_v19, %v1255_v30  ;;  %3283 = vrcp.f32 %v1273_v31  ;;  %v3038_v19 = vld [vmem:[%s4107_s15 + $0x8] sm:$0xff]  ;;  %v2859_v31 = vld [vmem:[%s4121_s22 + $0xe0] sm:$0xf] }
 0x3bb   : > { %v1267_v34 = vmul.f32 1.442695, %v1261_v32  ;;  %v3075_v32 = vld [vmem:[%s4121_s22 + $0xec] sm:$0xf0] }
 0x3bd   : > { %3285 = vpow2.f32 %v1267_v34  ;;  %v2860_v34 = vor.u32 %v3075_v32, %v2859_v31  ;;  %v2805_v31 = vld [vmem:[%s4121_s22 + $0x78] sm:$0xf0] }
 0x3be   : > { %3287 = vpow2.f32 %v1269_v36  ;;  %v2867_v36 = vld [vmem:[%s4121_s22 + $0xe8] sm:$0xf] }
 0x3bf   : > { %v3284_v35 = vpop.eup %3283 }
 0x3c0   : > { %v1287_v37 = vmul.f32 %v3284_v35, %v3280_v18  ;;  %v3039_v18 = vld [vmem:[%s4107_s15 + $0x10] sm:$0xff]  ;;  %v2861_v35 = vld [vmem:[%s4121_s22 + $0xf0] sm:$0xf0] }
 0x3c1   : > { %1465 = vmatpush.bf16.msrb.mxu1 %v3039_v18  ;;  %v2824_v18 = vor.u32 %v3062_v15, %v2821_v16 }
 0x3c2   : > { %v1291_v38 = vpack.c.bf16 %v1287_v37, %v1287_v37  ;;  %v3076_v37 = vld [vmem:[%s4121_s22 + $0xf4] sm:$0xf0] }
 0x3c3   : > { %v3286_v39 = vpop.eup %3285 }
 0x3c4   : > { %2709 = vmatmul.msk.bf16.vlgmr.msrb.gmra.mxu2 %vm1246_vm7, %v1291_v38  ;;  %v1277_v40 = vsel %vm1246_vm7, %v3286_v39, 0.0  ;;  %v3288_v41 = vpop.eup %3287  ;;  %v2864_v38 = vor.u32 %v3073_v33, %v2861_v35  ;;  %v2779_v33 = vld [vmem:[%s4121_s22 + $0x40] sm:$0xf]  ;;  %v3053_v35 = vld [vmem:[%s4121_s22 + $0x44] sm:$0xf] }
 0x3c5   : > { %1278 = vadd.xlane.f32.xlu1 %v1277_v40  ;;  %v1280_v43 = vsel %vm1246_vm7, %v3288_v41, 0.0  ;;  %1466 = vmatpush.bf16.msrb.mxu1 %v3038_v19  ;;  %v3074_v40 = vld [vmem:[%s4121_s22 + $0xec] sm:$0xf]  ;;  %v2795_v19 = vld [vmem:[%s4121_s22 + $0x60] sm:$0xf] }
 0x3c9   : > { %1467 = vmatpush.bf16.msrb.mxu1 %v3037_v21  ;;  %v3059_v21 = vld [vmem:[%s4121_s22 + $0x6c] sm:$0xf0] }
 0x3cb   : > { %v1125_v42 = vpop.permute.xlu0 %1124 }
 0x3cc   : > { %1128 = vst.msk [vmem:[#allocation5 + $0x4] sm:$0xf] %vm1107_vm4, %v1125_v42 }
 0x3cd   : > { %1138 = vrot.lane.b32.xlu2 %v4227_v44, %s3762_s25  ;;  %1281 = vadd.xlane.f32.xlu1 %v1280_v43 }
 0x3d3   : > { %v1153_v20 = vpop.permute.xlu0 %1152  ;;  %v1166_v45 = vld [vmem:[#allocation5 + $0x4] sm:$0xf] }
 0x3d4   : > { %1156 = vst.msk [vmem:[#allocation5 + $0xc] sm:$0xf] %vm1107_vm4, %v1153_v20  ;;  %v1319_v46 = vsel %vm1298_vm6, %v1166_v45, 0 }
 0x3d5   : > { %1328 = vmatpush.bf16.msra.mxu2 %v1319_v46  ;;  %v2843_v46 = vld [vmem:[%s4121_s22 + $0xc0] sm:$0xf] }
 0x3d9   : > { %1712 = vmatpush.bf16.msrb.mxu2 %v2860_v34  ;;  %v3055_v34 = vld [vmem:[%s4121_s22 + $0x4c] sm:$0xf0] }
 0x3db   : > { %v1168_v47 = vld [vmem:[#allocation5 + $0xc] sm:$0xf] }
 0x3dc   : > { %v1357_v48 = vsel %vm1298_vm6, %v1168_v47, 0  ;;  %v3071_v47 = vld [vmem:[%s4121_s22 + $0xcc] sm:$0xf0] }
 0x3dd   : > { %1366 = vmatpush.bf16.msra.mxu0 %v1357_v48  ;;  %v3069_v48 = vld [vmem:[%s4121_s22 + $0xc4] sm:$0xf] }
 0x428   : > { %v1276_v49 = vpop.xlane.xlu2 %1275 }
 0x429   : > { %3289 = vrcp.f32 %v1276_v49  ;;  %v2844_v49 = vor.u32 %v3071_v47, %v2843_v46  ;;  %v3051_v46 = vld [vmem:[%s4121_s22 + $0x2c] sm:$0xf0]  ;;  %v3049_v47 = vld [vmem:[%s4121_s22 + $0x24] sm:$0xf] }
 0x42b   : > { %1713 = vmatpush.bf16.msrb.mxu2 %v2844_v49  ;;  %v2765_v49 = vld [vmem:[%s4121_s22 + $0x30] sm:$0xf0] }
 0x42f   : > { %v3290_v50 = vpop.eup %3289 }
 0x430   : > { %v1288_v51 = vmul.f32 %v3290_v50, %v3282_v28  ;;  %v1139_v52 = vpop.permute.xlu2 %1138  ;;  %v2845_v50 = vld [vmem:[%s4121_s22 + $0xd0] sm:$0xf0] }
 0x431   : > { %1142 = vst.msk [vmem:[#allocation5 + $0x8] sm:$0xf] %vm1107_vm4, %v1139_v52  ;;  %v3072_v52 = vld [vmem:[%s4121_s22 + $0xd4] sm:$0xf0] }
 0x432   : > { %v1292_v44 = vpack.c.bf16 %v1288_v51, %v1288_v51  ;;  %v2851_v51 = vld [vmem:[%s4121_s22 + $0xc8] sm:$0xf] }
 0x434   : > { %2710 = vmatmul.msk.bf16.vlgmr.msra.gmra.mxu2 %vm1246_vm7, %v1292_v44  ;;  %v2848_v44 = vor.u32 %v3069_v48, %v2845_v50  ;;  %v2771_v50 = vld [vmem:[%s4121_s22 + $0x28] sm:$0xf] }
 0x438   : > { %v1279_v53 = vpop.xlane.xlu1 %1278  ;;  %v1167_v54 = vld [vmem:[#allocation5 + $0x8] sm:$0xf] }
 0x439   : > { %3291 = vrcp.f32 %v1279_v53  ;;  %v1338_v55 = vsel %vm1298_vm6, %v1167_v54, 0  ;;  %v2852_v53 = vor.u32 %v3072_v52, %v2851_v51  ;;  %v3070_v54 = vld [vmem:[%s4121_s22 + $0xcc] sm:$0xf]  ;;  %v3052_v51 = vld [vmem:[%s4121_s22 + $0x34] sm:$0xf0]  ;;  %v2768_v52 = vor.u32 %v3049_v47, %v2765_v49 }
 0x43a   : > { %1347 = vmatpush.bf16.msrb.mxu3 %v1338_v55  ;;  %v2853_v55 = vld [vmem:[%s4121_s22 + $0xd8] sm:$0xf0] }
 0x43e   : > { %1725 = vmatpush.bf16.msra.mxu3 %v2864_v38  ;;  %v2787_v38 = vld [vmem:[%s4121_s22 + $0x48] sm:$0xf] }
 0x43f   : > { %v3292_v56 = vpop.eup %3291 }
 0x440   : > { %v1289_v57 = vmul.f32 %v3292_v56, %v3286_v39  ;;  %v1282_v58 = vpop.xlane.xlu1 %1281  ;;  %v2868_v39 = vor.u32 %v3076_v37, %v2867_v36  ;;  %v2856_v56 = vor.u32 %v3070_v54, %v2853_v55  ;;  %v2780_v36 = vor.u32 %v3055_v34, %v2779_v33  ;;  %v2781_v37 = vld [vmem:[%s4121_s22 + $0x50] sm:$0xf0]  ;;  %v2773_v54 = vld [vmem:[%s4121_s22 + $0x38] sm:$0xf0]  ;;  %v2747_v55 = vld [vmem:[%s4121_s22] sm:$0xf] }
 0x441   : > { %3293 = vrcp.f32 %v1282_v58  ;;  %v3067_v58 = vld [vmem:[%s4121_s22 + $0xac] sm:$0xf0] }
 0x442   : > { %v1293_v59 = vpack.c.bf16 %v1289_v57, %v1289_v57  ;;  %1738 = vmatpush.bf16.msrb.mxu0 %v2868_v39  ;;  %1726 = vmatpush.bf16.msra.mxu3 %v2848_v44  ;;  %v2827_v57 = vld [vmem:[%s4121_s22 + $0xa0] sm:$0xf]  ;;  %v3056_v39 = vld [vmem:[%s4121_s22 + $0x54] sm:$0xf0]  ;;  %v2772_v44 = vor.u32 %v3052_v51, %v2771_v50 }
 0x444   : > { %2711 = vmatmul.msk.bf16.vlgmr.msrb.gmra.mxu3 %vm1246_vm7, %v1293_v59  ;;  %v3065_v59 = vld [vmem:[%s4121_s22 + $0xa4] sm:$0xf] }
 0x446   : > { %1739 = vmatpush.bf16.msrb.mxu0 %v2852_v53  ;;  %v3050_v53 = vld [vmem:[%s4121_s22 + $0x2c] sm:$0xf] }
 0x447   : > { %v3294_v60 = vpop.eup %3293  ;;  %v1311_v61 = vpop.f32.mrf.mxu2 }
 0x448   : > { %v1290_v62 = vmul.f32 %v3294_v60, %v3288_v41  ;;  %v1372_v63 = vpack.c.bf16 %v1311_v61, %v1311_v61  ;;  %v2828_v60 = vor.u32 %v3067_v58, %v2827_v57  ;;  %v2829_v61 = vld [vmem:[%s4121_s22 + $0xb0] sm:$0xf0]  ;;  %v3047_v57 = vld [vmem:[%s4121_s22 + $0xc] sm:$0xf0]  ;;  %v3045_v58 = vld [vmem:[%s4121_s22 + $0x4] sm:$0xf] }
 0x44a   : > { %v1294_v0 = vpack.c.bf16 %v1290_v62, %v1290_v62  ;;  %1376 = vst.msk [vmem:[#allocation6] sm:$0xf] %vm1107_vm4, %v1372_v63  ;;  %v2835_v62 = vld [vmem:[%s4121_s22 + $0xa8] sm:$0xf]  ;;  %v3068_v63 = vld [vmem:[%s4121_s22 + $0xb4] sm:$0xf0]  ;;  %1714 = vmatpush.bf16.msrb.mxu2 %v2828_v60  ;;  %v2748_v60 = vor.u32 %v3047_v57, %v2747_v55 }
 0x44b   : > { %v3098_v57 = vld [vmem:[%s4129_s2 + $0xa8] sm:$0xff] }
 0x44c   : > { %2712 = vmatmul.msk.bf16.vlgmr.msra.gmra.mxu0 %vm1246_vm7, %v1294_v0  ;;  %v2832_v0 = vor.u32 %v3065_v59, %v2829_v61  ;;  %v2749_v59 = vld [vmem:[%s4121_s22 + $0x10] sm:$0xf0] }
 0x44d   : > { %v2752_v61 = vor.u32 %v3045_v58, %v2749_v59  ;;  %v3106_v58 = vld [vmem:[%s4129_s2 + $0xe8] sm:$0xff] }
 0x44e   : > { %1727 = vmatpush.bf16.msra.mxu3 %v2832_v0  ;;  %v3046_v0 = vld [vmem:[%s4121_s22 + $0xc] sm:$0xf] }
 0x44f   : > { %v1313_v2 = vpop.f32.mrf.mxu2 }
 0x450   : > { %v2836_v2 = vor.u32 %v3068_v63, %v2835_v62  ;;  %v2755_v62 = vld [vmem:[%s4121_s22 + $0x8] sm:$0xf]  ;;  %v3048_v63 = vld [vmem:[%s4121_s22 + $0x14] sm:$0xf0] }
 0x452   : > { %1740 = vmatpush.bf16.msrb.mxu0 %v2836_v2  ;;  %v2756_v2 = vor.u32 %v3048_v63, %v2755_v62 }
 0x4b7   : > { %v1330_v5 = vpop.f32.mrf.mxu2 }
 0x4b8   : > { %v1373_v6 = vpack.c.bf16 %v1330_v5, %v1330_v5  ;;  %v2840_v5 = vor.u32 %v3066_v3, %v2837_v4  ;;  %v2757_v3 = vld [vmem:[%s4121_s22 + $0x18] sm:$0xf0] }
 0x4b9   : > { %v2760_v4 = vor.u32 %v3046_v0, %v2757_v3  ;;  %v3091_v3 = vld [vmem:[%s4129_s2 + $0x70] sm:$0xff] }
 0x4ba   : > { %1378 = vrot.lane.b32.xlu0 %v1373_v6, %s3760_s26  ;;  %v2811_v6 = vld [vmem:[%s4121_s22 + $0x80] sm:$0xf] }
 0x4bf   : > { %v1332_v7 = vpop.f32.mrf.mxu2 }
 0x4c0   : > { %v3063_v7 = vld [vmem:[%s4121_s22 + $0x8c] sm:$0xf0] }
 0x4c7   : > { %v1349_v8 = vpop.f32.mrf.mxu3 }
 0x4c8   : > { %v1374_v9 = vpack.c.bf16 %v1349_v8, %v1349_v8  ;;  %v3061_v8 = vld [vmem:[%s4121_s22 + $0x84] sm:$0xf] }
 0x4c9   : > { %v1368_v10 = vpop.f32.mrf.mxu0 }
 0x4ca   : > { %v1375_v11 = vpack.c.bf16 %v1368_v10, %v1368_v10  ;;  %1384 = vrot.lane.b32.xlu1 %v1374_v9, %s3762_s25  ;;  %v2812_v9 = vor.u32 %v3063_v7, %v2811_v6  ;;  %v2813_v10 = vld [vmem:[%s4121_s22 + $0x90] sm:$0xf0] }
 0x4cc   : > { %1390 = vrot.lane.b32.xlu0 %v1375_v11, %s3761_s16  ;;  %v2819_v11 = vld [vmem:[%s4121_s22 + $0x88] sm:$0xf]  ;;  %1715 = vmatpush.bf16.msrb.mxu2 %v2812_v9 }
 0x4cf   : > { %v1351_v12 = vpop.f32.mrf.mxu3 }
 0x4d0   : > { %v3064_v12 = vld [vmem:[%s4121_s22 + $0x94] sm:$0xf0] }
 0x4d1   : > { %v1370_v13 = vpop.f32.mrf.mxu0  ;;  %v2820_v14 = vor.u32 %v3064_v12, %v2819_v11 }
 0x4d2   : > { %v2816_v13 = vor.u32 %v3061_v8, %v2813_v10 }
 0x4d3   : > { %1741 = vmatpush.bf16.msrb.mxu0 %v2820_v14  ;;  %v3272_v14 = vld [vmem:[%s859_s18] ss:$0 sm:$0xff] }
 0x4d4   : > { %1728 = vmatpush.bf16.msra.mxu3 %v2816_v13 }
 0x52c   : > { %v1379_v22 = vpop.permute.xlu0 %1378 }
 0x52d   : > { %1382 = vst.msk [vmem:[#allocation6] sm:$0xf] %vm1381_vm8, %v1379_v22  ;;  %v3057_v22 = vld [vmem:[%s4121_s22 + $0x64] sm:$0xf] }
 0x53c   : > { %v1385_v23 = vpop.permute.xlu1 %1384 }
 0x53d   : > { %1388 = vst.msk [vmem:[#allocation6] sm:$0xf] %vm1387_vm9, %v1385_v23  ;;  %v2796_v23 = vor.u32 %v3059_v21, %v2795_v19 }
 0x53e   : > { %v1391_v24 = vpop.permute.xlu0 %1390 }
 0x53f   : > { %1394 = vst.msk [vmem:[#allocation6] sm:$0xf] %vm1393_vm10, %v1391_v24  ;;  %v2797_v24 = vld [vmem:[%s4121_s22 + $0x70] sm:$0xf0]  ;;  %1716 = vmatpush.bf16.msrb.mxu2 %v2796_v23  ;;  %v1542_v23 = vld [vmem:[%s4123_s7] sm:$0xf] }
 0x540   : > { %v1545_v33 = vperm.slane %v1542_v23, 1 }
 0x543   : > { %1717 = vmatpush.bf16.msrb.mxu2 %v2780_v36  ;;  %v3099_v36 = vld [vmem:[%s4129_s2 + $0xb0] sm:$0xff] }
 0x546   : > { %v1395_v25 = vld [vmem:[#allocation6] sm:$0xf] }
 0x547   : > { %1468 = vmatmul.bf16.vlgmr.msrb.gmra.mxu1 %v1395_v25  ;;  %v2803_v25 = vld [vmem:[%s4121_s22 + $0x68] sm:$0xf] }
 0x5c4   : > { %v1469_v27 = vpop.f32.mrf.mxu1 }
 0x5c5   : > { %v1473_v28 = vadd.f32 %v1469_v27, %v4155_v1  ;;  %v2869_v1 = vld [vmem:[%s4121_s22 + $0xf8] sm:$0xf0]  ;;  %v2800_v27 = vor.u32 %v3057_v22, %v2797_v24  ;;  %v1546_v24 = vperm.slane %v1542_v23, 2 }
 0x5c6   : > { %v2872_v41 = vor.u32 %v3074_v40, %v2869_v1  ;;  %v2784_v40 = vor.u32 %v3053_v35, %v2781_v37  ;;  %v2788_v1 = vor.u32 %v3056_v39, %v2787_v38  ;;  %v3107_v37 = vld [vmem:[%s4129_s2 + $0xf0] sm:$0xff] }
 0x5c7   : > { %v4286_v29 = vadd.f32 %v3271_v26, %v1473_v28  ;;  %v3060_v26 = vld [vmem:[%s4121_s22 + $0x74] sm:$0xf0]  ;;  %1729 = vmatpush.bf16.msra.mxu3 %v2800_v27 }
 0x5c8   : > { %1751 = vmatpush.bf16.msra.mxu1 %v2872_v41  ;;  %v2804_v28 = vor.u32 %v3060_v26, %v2803_v25  ;;  %v3054_v41 = vld [vmem:[%s4121_s22 + $0x4c] sm:$0xf]  ;;  %v1547_v25 = vperm.slane %v1542_v23, 3 }
 0x5c9   : > { %1481 = vadd.xlane.f32.xlu2 %v4286_v29 }
 0x5ca   : > { %1742 = vmatpush.bf16.msrb.mxu0 %v2804_v28  ;;  %v3100_v28 = vld [vmem:[%s4129_s2 + $0xb8] sm:$0xff] }
 0x5cb   : > { %1730 = vmatpush.bf16.msra.mxu3 %v2784_v40 }
 0x5cc   : > { %v1471_v30 = vpop.f32.mrf.mxu1  ;;  %1752 = vmatpush.bf16.msra.mxu1 %v2856_v56  ;;  %v2776_v56 = vor.u32 %v3050_v53, %v2773_v54 }
 0x5cd   : > { %v3058_v30 = vld [vmem:[%s4121_s22 + $0x6c] sm:$0xf] }
 0x5ce   : > { %v2808_v32 = vor.u32 %v3058_v30, %v2805_v31  ;;  %1743 = vmatpush.bf16.msrb.mxu0 %v2788_v1  ;;  %v3108_v30 = vld [vmem:[%s4129_s2 + $0xf8] sm:$0xff] }
 0x5cf   : > { %1731 = vmatpush.bf16.msra.mxu3 %v2768_v52 }
 0x5d0   : > { %1753 = vmatpush.bf16.msra.mxu1 %v2840_v5 }
 0x5d2   : > { %1744 = vmatpush.bf16.msrb.mxu0 %v2772_v44 }
 0x5d3   : > { %1732 = vmatpush.bf16.msra.mxu3 %v2752_v61 }
 0x5d4   : > { %1754 = vmatpush.bf16.msra.mxu1 %v2824_v18  ;;  %v3273_v18 = vld [vmem:[%s722_s9] ss:$0 sm:$0xff]  ;;  %s4682_s9 = sld [smem:[#allocation35_spill]] }
 0x5d6   : > { %1745 = vmatpush.bf16.msrb.mxu0 %v2756_v2  ;;  %v3083_v2 = vld [vmem:[%s4129_s2 + $0x30] sm:$0xff] }
 0x5d8   : > { %1755 = vmatpush.bf16.msra.mxu1 %v2808_v32  ;;  %v1544_v32 = vperm.slane %v1542_v23, 0 }
 0x5da   : > { %2226 = vmatpush.bf16.msra.mxu0 %v3100_v28  ;;  %v3090_v28 = vld [vmem:[%s4129_s2 + $0x68] sm:$0xff]  ;;  %p3005_p11 = scmp.ne.s32.totalorder %s4682_s9, 1 }
 0x5db   : > { %s4683_s7 = sld [smem:[#allocation57_spill]] (!%p3005_p11) }
 0x5de   : > { %2227 = vmatpush.bf16.msra.mxu0 %v3099_v36  ;;  %v3104_v36 = vld [vmem:[%s4129_s2 + $0xd8] sm:$0xff] }
 0x5e2   : > { %2228 = vmatpush.bf16.msra.mxu0 %v3098_v57  ;;  %v3095_v57 = vld [vmem:[%s4129_s2 + $0x90] sm:$0xff] }
 0x63c   : > { %v1482_v42 = vpop.xlane.xlu2 %1481 }
 0x63d   : > { %v1483_v43 = vmul.f32 %v1482_v42, %v4164_v17  ;;  %v2789_v42 = vld [vmem:[%s4121_s22 + $0x58] sm:$0xf0] }
 0x63f   : > { %v4299_v20 = vsub.f32 %v4286_v29, %v1483_v43  ;;  %v2792_v43 = vor.u32 %v3054_v41, %v2789_v42 }
 0x641   : > { %v1485_v45 = vmul.f32 %v4299_v20, %v4299_v20  ;;  %1756 = vmatpush.bf16.msra.mxu1 %v2792_v43  ;;  %v3084_v43 = vld [vmem:[%s4129_s2 + $0x38] sm:$0xff] }
 0x643   : > { %1486 = vadd.xlane.f32.xlu0 %v1485_v45  ;;  %v2763_v45 = vld [vmem:[%s4121_s22 + $0x20] sm:$0xf] }
 0x644   : > { %v2764_v48 = vor.u32 %v3051_v46, %v2763_v45  ;;  %v3092_v45 = vld [vmem:[%s4129_s2 + $0x78] sm:$0xff] }
 0x645   : > { %1757 = vmatpush.bf16.msra.mxu1 %v2776_v56  ;;  %2213 = vmatpush.bf16.msrb.mxu3 %v3092_v45 }
 0x646   : > { %1718 = vmatpush.bf16.msrb.mxu2 %v2764_v48 }
 0x649   : > { %1758 = vmatpush.bf16.msra.mxu1 %v2760_v4  ;;  %v3097_v4 = vld [vmem:[%s4129_s2 + $0xa0] sm:$0xff]  ;;  %2214 = vmatpush.bf16.msrb.mxu3 %v3091_v3  ;;  %v3088_v3 = vld [vmem:[%s4129_s2 + $0x58] sm:$0xff] }
 0x64a   : > { %1719 = vmatpush.bf16.msrb.mxu2 %v2748_v60  ;;  %2229 = vmatpush.bf16.msra.mxu0 %v3097_v4 }
 0x64d   : > { %2239 = vmatpush.bf16.msrb.mxu1 %v3108_v30  ;;  %v3096_v30 = vld [vmem:[%s4129_s2 + $0x98] sm:$0xff]  ;;  %2215 = vmatpush.bf16.msrb.mxu3 %v3090_v28 }
 0x64e   : > { %2200 = vmatpush.bf16.msra.mxu2 %v3084_v43  ;;  %2230 = vmatpush.bf16.msra.mxu0 %v3096_v30 }
 0x651   : > { %2240 = vmatpush.bf16.msrb.mxu1 %v3107_v37  ;;  %v3081_v37 = vld [vmem:[%s4129_s2 + $0x20] sm:$0xff] }
 0x652   : > { %2201 = vmatpush.bf16.msra.mxu2 %v3083_v2  ;;  %v3080_v2 = vld [vmem:[%s4129_s2 + $0x18] sm:$0xff]  ;;  %2231 = vmatpush.bf16.msra.mxu0 %v3095_v57 }
 0x655   : > { %2241 = vmatpush.bf16.msrb.mxu1 %v3106_v58  ;;  %v3103_v58 = vld [vmem:[%s4129_s2 + $0xd0] sm:$0xff] }
 0x6b6   : > { %v1487_v5 = vpop.xlane.xlu0 %1486 }
 0x6b7   : > { %v1488_v6 = vmul.f32 %v1487_v5, %v4164_v17 }
 0x6b9   : > { %v1489_v7 = vadd.f32 1e-05, %v1488_v6 }
 0x6bb   : > { %3295 = vrsqrt.f32 %v1489_v7  ;;  %vm1496_vm12 = vweird.f32 %v1489_v7 }
 0x6c1   : > { %v3296_v8 = vpop.eup %3295 }
 0x6c2   : > { %v1491_v9 = vmul.f32 %v3296_v8, %v1489_v7  ;;  %vm1497_vm11 = vweird.f32 %v3296_v8 }
 0x6c3   : > { %vm1498_vm13 = vmor %vm1496_vm12, %vm1497_vm11 }
 0x6c4   : > { %v1492_v10 = vmul.f32 %v3296_v8, %v1491_v9 }
 0x6c6   : > { %v1493_v11 = vmul.f32 0.5, %v1492_v10  ;;  %v3105_v10 = vld [vmem:[%s4129_s2 + $0xe0] sm:$0xff] }
 0x6c7   : > { %2242 = vmatpush.bf16.msrb.mxu1 %v3105_v10 }
 0x6c8   : > { %v1494_v12 = vsub.f32 1.5, %v1493_v11 }
 0x6ca   : > { %v1495_v13 = vmul.f32 %v3296_v8, %v1494_v12 }
 0x6cb   : > { %2243 = vmatpush.bf16.msrb.mxu1 %v3104_v36 }
 0x6cc   : > { %v1499_v15 = vsel %vm1498_vm13, %v3296_v8, %v1495_v13 }
 0x6cd   : > { %v1500_v16 = vmul.f32 %v1499_v15, %v4299_v20 }
 0x6cf   : > { %v1504_v19 = vmul.f32 %v3272_v14, %v1500_v16  ;;  %2244 = vmatpush.bf16.msrb.mxu1 %v3103_v58 }
 0x6d1   : > { %v1508_v21 = vadd.f32 %v3273_v18, %v1504_v19 }
 0x6d3   : > { %v1509_v22 = vpack.c.bf16 %v1508_v21, %v1508_v21 }
 0x6d5   : > { %1720 = vmatmul.bf16.vlgmr.msrb.gmra.mxu2 %v1509_v22  ;;  %1733 = vmatmul.bf16.vlgmr.msra.gmra.mxu3 %v1509_v22 }
 0x6d6   : > { %1746 = vmatmul.bf16.vlgmr.msrb.gmra.mxu0 %v1509_v22  ;;  %1759 = vmatmul.bf16.vlgmr.msra.gmra.mxu1 %v1509_v22 }
 0x753   : > { %v1747_v26 = vpop.f32.mrf.mxu0  ;;  %v1760_v27 = vpop.f32.mrf.mxu1 }
 0x754   : > { %v4371_v31 = vadd.f32 %v1747_v26, %v1546_v24  ;;  %v4373_v20 = vadd.f32 %v1760_v27, %v1547_v25  ;;  %v3082_v27 = vld [vmem:[%s4129_s2 + $0x28] sm:$0xff] }
 0x755   : > { %2202 = vmatpush.bf16.msra.mxu2 %v3082_v27 }
 0x756   : > { %v1770_v34 = vmul.f32 0.70710677, %v4371_v31  ;;  %v1771_v35 = vmul.f32 0.70710677, %v4373_v20  ;;  %v4476_v36 = vmul.f32 0.5, %v4371_v31 }
 0x758   : > { %v4379_v38 = vclamps-f32 %v1770_v34, 4.0  ;;  %v4381_v39 = vclamps-f32 %v1771_v35, 4.0  ;;  %v1721_v40 = vpop.f32.mrf.mxu2  ;;  %v1734_v1 = vpop.f32.mrf.mxu3 }
 0x759   : > { %v4383_v41 = vadd.f32 %v1721_v40, %v1544_v32  ;;  %v4385_v42 = vadd.f32 %v1734_v1, %v1545_v33  ;;  %v3089_v40 = vld [vmem:[%s4129_s2 + $0x60] sm:$0xff]  ;;  %2203 = vmatpush.bf16.msra.mxu2 %v3081_v37 }
 0x75a   : > { %v4391_v46 = vmul.f32 %v4379_v38, %v4379_v38  ;;  %v4395_v47 = vmul.f32 %v4381_v39, %v4381_v39  ;;  %2216 = vmatpush.bf16.msrb.mxu3 %v3089_v40 }
 0x75b   : > { %v1768_v48 = vmul.f32 0.70710677, %v4383_v41  ;;  %v1769_v49 = vmul.f32 0.70710677, %v4385_v42  ;;  %v1749_v50 = vpop.f32.mrf.mxu0  ;;  %v1762_v51 = vpop.f32.mrf.mxu1 }
 0x75c   : > { %v1786_v52 = vmul.f32 -2.7261424e-10, %v4391_v46  ;;  %v1838_v44 = vmul.f32 -1.45660715e-05, %v4391_v46  ;;  %v1787_v53 = vmul.f32 -2.7261424e-10, %v4395_v47 }
 0x75d   : > { %v1839_v54 = vmul.f32 -1.45660715e-05, %v4395_v47  ;;  %v4403_v55 = vclamps-f32 %v1768_v48, 4.0  ;;  %v4405_v56 = vclamps-f32 %v1769_v49, 4.0  ;;  %2204 = vmatpush.bf16.msra.mxu2 %v3080_v2 }
 0x75e   : > { %v1790_v59 = vadd.f32 2.7706815e-08, %v1786_v52  ;;  %v1842_v60 = vadd.f32 -0.00021337405, %v1838_v44  ;;  %v1791_v61 = vadd.f32 2.7706815e-08, %v1787_v53  ;;  %2217 = vmatpush.bf16.msrb.mxu3 %v3088_v3 }
 0x75f   : > { %v1843_v62 = vadd.f32 -0.00021337405, %v1839_v54  ;;  %v4411_v63 = vmul.f32 %v4403_v55, %v4403_v55  ;;  %v4415_v0 = vmul.f32 %v4405_v56, %v4405_v56 }
 0x760   : > { %v1794_v5 = vmul.f32 %v1790_v59, %v4391_v46  ;;  %v1846_v6 = vmul.f32 %v1842_v60, %v4391_v46  ;;  %v1795_v7 = vmul.f32 %v1791_v61, %v4395_v47  ;;  %v1723_v8 = vpop.f32.mrf.mxu2  ;;  %v1736_v9 = vpop.f32.mrf.mxu3 }
 0x761   : > { %v1847_v11 = vmul.f32 %v1843_v62, %v4395_v47  ;;  %v1784_v12 = vmul.f32 -2.7261424e-10, %v4411_v63  ;;  %v1836_v13 = vmul.f32 -1.45660715e-05, %v4411_v63  ;;  %v1785_v14 = vmul.f32 -2.7261424e-10, %v4415_v0 }
 0x762   : > { %v1798_v15 = vadd.f32 -2.101024e-06, %v1794_v5  ;;  %v1850_v16 = vadd.f32 -0.001682827, %v1846_v6  ;;  %v1799_v18 = vadd.f32 -2.101024e-06, %v1795_v7 }
 0x763   : > { %v1851_v19 = vadd.f32 -0.001682827, %v1847_v11  ;;  %v1788_v21 = vadd.f32 2.7706815e-08, %v1784_v12  ;;  %v1840_v22 = vadd.f32 -0.00021337405, %v1836_v13 }
 0x764   : > { %v1802_v23 = vmul.f32 %v1798_v15, %v4391_v46  ;;  %v1854_v24 = vmul.f32 %v1850_v16, %v4391_v46  ;;  %v1803_v25 = vmul.f32 %v1799_v18, %v4395_v47  ;;  %v1789_v26 = vadd.f32 2.7706815e-08, %v1785_v14  ;;  %v3094_v11 = vld [vmem:[%s4129_s2 + $0x88] sm:$0xff]  ;;  %v3079_v16 = vld [vmem:[%s4129_s2 + $0x10] sm:$0xff] }
 0x765   : > { %v1855_v32 = vmul.f32 %v1851_v19, %v4395_v47  ;;  %v1792_v33 = vmul.f32 %v1788_v21, %v4411_v63  ;;  %v1844_v34 = vmul.f32 %v1840_v22, %v4411_v63  ;;  %v1837_v35 = vmul.f32 -1.45660715e-05, %v4415_v0  ;;  %v3102_v12 = vld [vmem:[%s4129_s2 + $0xc8] sm:$0xff]  ;;  %v3087_v18 = vld [vmem:[%s4129_s2 + $0x50] sm:$0xff]  ;;  %2232 = vmatpush.bf16.msra.mxu0 %v3094_v11  ;;  %2205 = vmatpush.bf16.msra.mxu2 %v3079_v16 }
 0x766   : > { %v1806_v1 = vadd.f32 -5.6925062e-05, %v1802_v23  ;;  %v1858_v43 = vadd.f32 -0.0073733293, %v1854_v24  ;;  %v1807_v45 = vadd.f32 -5.6925062e-05, %v1803_v25  ;;  %v1793_v48 = vmul.f32 %v1789_v26, %v4415_v0  ;;  %2245 = vmatpush.bf16.msrb.mxu1 %v3102_v12  ;;  %2218 = vmatpush.bf16.msrb.mxu3 %v3087_v18 }
 0x767   : > { %v1859_v49 = vadd.f32 -0.0073733293, %v1855_v32  ;;  %v1796_v50 = vadd.f32 -2.101024e-06, %v1792_v33  ;;  %v1848_v51 = vadd.f32 -0.001682827, %v1844_v34 }
 0x768   : > { %v1810_v52 = vmul.f32 %v1806_v1, %v4391_v46  ;;  %v1862_v44 = vmul.f32 %v1858_v43, %v4391_v46  ;;  %v1811_v53 = vmul.f32 %v1807_v45, %v4395_v47  ;;  %v1797_v54 = vadd.f32 -2.101024e-06, %v1793_v48  ;;  %v3093_v23 = vld [vmem:[%s4129_s2 + $0x80] sm:$0xff]  ;;  %v3078_v33 = vld [vmem:[%s4129_s2 + $0x8] sm:$0xff] }
 0x769   : > { %v1863_v59 = vmul.f32 %v1859_v49, %v4395_v47  ;;  %v1800_v60 = vmul.f32 %v1796_v50, %v4411_v63  ;;  %v1852_v61 = vmul.f32 %v1848_v51, %v4411_v63  ;;  %v1841_v62 = vadd.f32 -0.00021337405, %v1837_v35  ;;  %v3101_v24 = vld [vmem:[%s4129_s2 + $0xc0] sm:$0xff]  ;;  %v3086_v34 = vld [vmem:[%s4129_s2 + $0x48] sm:$0xff]  ;;  %2233 = vmatpush.bf16.msra.mxu0 %v3093_v23  ;;  %2206 = vmatpush.bf16.msra.mxu2 %v3078_v33 }
 0x76a   : > { %v1814_v4 = vadd.f32 -0.00073499064, %v1810_v52  ;;  %v4452_v5 = vadd.f32 -0.014264739, %v1862_v44  ;;  %v1815_v6 = vadd.f32 -0.00073499064, %v1811_v53  ;;  %v1801_v15 = vmul.f32 %v1797_v54, %v4415_v0  ;;  %2246 = vmatpush.bf16.msrb.mxu1 %v3101_v24  ;;  %2219 = vmatpush.bf16.msrb.mxu3 %v3086_v34 }
 0x76b   : > { %v4454_v7 = vadd.f32 -0.014264739, %v1863_v59  ;;  %v1804_v8 = vadd.f32 -5.6925062e-05, %v1800_v60  ;;  %v1856_v9 = vadd.f32 -0.0073733293, %v1852_v61  ;;  %v1845_v22 = vmul.f32 %v1841_v62, %v4415_v0 }
 0x76c   : > { %v1818_v10 = vmul.f32 %v1814_v4, %v4391_v46  ;;  %3297 = vrcp.f32 %v4452_v5  ;;  %v1819_v13 = vmul.f32 %v1815_v6, %v4395_v47  ;;  %v1805_v32 = vadd.f32 -5.6925062e-05, %v1801_v15  ;;  %v3085_v53 = vld [vmem:[%s4129_s2 + $0x40] sm:$0xff] }
 0x76d   : > { %3299 = vrcp.f32 %v4454_v7  ;;  %v1808_v19 = vmul.f32 %v1804_v8, %v4411_v63  ;;  %v1860_v21 = vmul.f32 %v1856_v9, %v4411_v63  ;;  %v1849_v1 = vadd.f32 -0.001682827, %v1845_v22 }
 0x76e   : > { %v1822_v14 = vadd.f32 -0.0029546, %v1818_v10  ;;  %v1823_v25 = vadd.f32 -0.0029546, %v1819_v13  ;;  %vm1901_vm14 = vweird.f32 %v4452_v5  ;;  %v1905_v31 = vand.u32 2147483647, %v4452_v5  ;;  %2220 = vmatpush.bf16.msrb.mxu3 %v3085_v53 }
 0x76f   : > { %v1812_v26 = vadd.f32 -0.00073499064, %v1808_v19  ;;  %v4470_v27 = vadd.f32 -0.014264739, %v1860_v21  ;;  %v1907_v48 = vand.u32 2147483648, %v4452_v5  ;;  %v1921_v52 = vand.u32 2147483648, %v4454_v7 }
 0x770   : > { %v1826_v30 = vmul.f32 %v1822_v14, %v4391_v46  ;;  %v1827_v46 = vmul.f32 %v1823_v25, %v4395_v47  ;;  %v1919_v49 = vand.u32 2147483647, %v4454_v7  ;;  %v1809_v44 = vmul.f32 %v1805_v32, %v4415_v0  ;;  %v3077_v47 = vld [vmem:[%s4129_s2] sm:$0xff] }
 0x771   : > { %v1816_v40 = vmul.f32 %v1812_v26, %v4411_v63  ;;  %3301 = vrcp.f32 %v4470_v27  ;;  %v1853_v58 = vmul.f32 %v1849_v1, %v4415_v0  ;;  %vm1915_vm0 = vweird.f32 %v4454_v7  ;;  %2207 = vmatpush.bf16.msra.mxu2 %v3077_v47 }
 0x772   : > { %v3298_v28 = vpop.eup %3297  ;;  %v1830_v50 = vadd.f32 -0.016096033, %v1826_v30  ;;  %v1831_v59 = vadd.f32 -0.016096033, %v1827_v46  ;;  %vm4493_vm2 = vcmp.eq.f32.partialorder %v1905_v31, 8.507059e+37  ;;  %v1908_v2 = vor.u32 1.1754944e-38, %v1907_v48 }
 0x773   : > { %v3300_v35 = vpop.eup %3299  ;;  %v1897_v37 = vmul.f32 %v3298_v28, %v4452_v5  ;;  %vm1902_vm15 = vweird.f32 %v3298_v28  ;;  %v1820_v57 = vadd.f32 -0.0029546, %v1816_v40  ;;  %v1857_v3 = vadd.f32 -0.0073733293, %v1853_v58 }
 0x774   : > { %v1911_v43 = vmul.f32 %v3300_v35, %v4454_v7  ;;  %vm1916_vm1 = vweird.f32 %v3300_v35  ;;  %vm1903_vm3 = vmor %vm1901_vm14, %vm1902_vm15  ;;  %vm1920_vm4 = vcmp.eq.f32.partialorder %v1919_v49, 8.507059e+37  ;;  %v1922_v8 = vor.u32 1.1754944e-38, %v1921_v52 }
 0x775   : > { %v1898_v45 = vsub.f32 1.0, %v1897_v37  ;;  %v1813_v9 = vadd.f32 -0.00073499064, %v1809_v44  ;;  %v1834_v10 = vmul.f32 %v4379_v38, %v1830_v50  ;;  %vm1917_vm5 = vmor %vm1915_vm0, %vm1916_vm1  ;;  %v1824_v12 = vmul.f32 %v1820_v57, %v4411_v63 }
 0x776   : > { %v1912_v51 = vsub.f32 1.0, %v1911_v43  ;;  %v1835_v14 = vmul.f32 %v4381_v39, %v1831_v59  ;;  %v1861_v16 = vmul.f32 %v1857_v3, %v4415_v0  ;;  %v1877_v21 = vand.u32 2147483647, %v4470_v27 }
 0x777   : > { %v1899_v54 = vmul.f32 %v3298_v28, %v1898_v45  ;;  %v3302_v4 = vpop.eup %3301  ;;  %v1879_v7 = vand.u32 2147483648, %v4470_v27  ;;  %v1817_v63 = vmul.f32 %v1813_v9, %v4415_v0  ;;  %v1828_v25 = vadd.f32 -0.016096033, %v1824_v12  ;;  %v3274_v9 = vld [vmem:[%s761_s27] ss:$0 sm:$0xff]  ;;  %s4684_s27 = sld [smem:[#allocation58_spill]] (!%p3005_p11) }
 0x778   : > { %v1913_v60 = vmul.f32 %v3300_v35, %v1912_v51  ;;  %v1869_v13 = vmul.f32 %v3302_v4, %v4470_v27  ;;  %v1865_v23 = vadd.f32 -0.014264739, %v1861_v16  ;;  %vm1874_vm6 = vweird.f32 %v3302_v4 }
 0x779   : > { %v1900_v61 = vadd.f32 %v3298_v28, %v1899_v54  ;;  %v1767_v39 = vmul.f32 0.5, %v4373_v20  ;;  %vm1873_vm7 = vweird.f32 %v4470_v27  ;;  %v1880_v34 = vor.u32 1.1754944e-38, %v1879_v7 }
 0x77a   : > { %v1914_v6 = vadd.f32 %v3300_v35, %v1913_v60  ;;  %v1870_v38 = vsub.f32 1.0, %v1869_v13  ;;  %3303 = vrcp.f32 %v1865_v23  ;;  %vm1875_vm8 = vmor %vm1873_vm7, %vm1874_vm6  ;;  %v1832_v40 = vmul.f32 %v4403_v55, %v1828_v25 }
 0x77b   : > { %v1904_v11 = vsel %vm1903_vm3, %v3298_v28, %v1900_v61  ;;  %vm1878_vm9 = vcmp.eq.f32.partialorder %v1877_v21, 8.507059e+37  ;;  %v1893_v52 = vand.u32 2147483648, %v1865_v23  ;;  %v1891_v47 = vand.u32 2147483647, %v1865_v23 }
 0x77c   : > { %v1909_v5 = vsel %vm4493_vm2, %v1908_v2, %v1904_v11  ;;  %v1918_v15 = vsel %vm1917_vm5, %v3300_v35, %v1914_v6  ;;  %v1871_v26 = vmul.f32 %v3302_v4, %v1870_v38  ;;  %v1821_v35 = vadd.f32 -0.0029546, %v1817_v63 }
 0x77d   : > { %v1926_v18 = vmul.f32 %v1909_v5, %v1834_v10  ;;  %v1923_v19 = vsel %vm1920_vm4, %v1922_v8, %v1918_v15  ;;  %vm1887_vm11 = vweird.f32 %v1865_v23  ;;  %v1894_v54 = vor.u32 1.1754944e-38, %v1893_v52 }
 0x77e   : > { %v1927_v22 = vmul.f32 %v1923_v19, %v1835_v14  ;;  %v1872_v32 = vadd.f32 %v3302_v4, %v1871_v26  ;;  %v1825_v31 = vmul.f32 %v1821_v35, %v4415_v0  ;;  %vm1892_vm13 = vcmp.eq.f32.partialorder %v1891_v47, 8.507059e+37 }
 0x77f   : > { %v1930_v24 = vadd.f32 1.0, %v1926_v18  ;;  %v1765_v59 = vmul.f32 0.5, %v4385_v42 }
 0x780   : > { %v1931_v28 = vadd.f32 1.0, %v1927_v22  ;;  %v1876_v1 = vsel %vm1875_vm8, %v3302_v4, %v1872_v32  ;;  %v3304_v20 = vpop.eup %3303  ;;  %v1829_v51 = vadd.f32 -0.016096033, %v1825_v31 }
 0x781   : > { %v1934_v30 = vmul.f32 %v1930_v24, %v4476_v36  ;;  %v1881_v43 = vsel %vm1878_vm9, %v1880_v34, %v1876_v1  ;;  %v1764_v36 = vmul.f32 0.5, %v4383_v41  ;;  %v1883_v48 = vmul.f32 %v3304_v20, %v1865_v23 }
 0x782   : > { %v1935_v33 = vmul.f32 %v1931_v28, %v1767_v39  ;;  %v1924_v45 = vmul.f32 %v1881_v43, %v1832_v40  ;;  %vm1888_vm10 = vweird.f32 %v3304_v20  ;;  %v1833_v0 = vmul.f32 %v4405_v56, %v1829_v51 }
 0x783   : > { %v1938_v37 = vpack.c.bf16 %v1934_v30, %v1934_v30  ;;  %v1884_v50 = vsub.f32 1.0, %v1883_v48  ;;  %vm1889_vm12 = vmor %vm1887_vm11, %vm1888_vm10 }
 0x784   : > { %v1939_v46 = vpack.c.bf16 %v1935_v33, %v1935_v33  ;;  %v1928_v27 = vadd.f32 1.0, %v1924_v45 }
 0x785   : > { %2234 = vmatmul.bf16.vlgmr.msra.gmra.mxu0 %v1938_v37  ;;  %v1885_v55 = vmul.f32 %v3304_v20, %v1884_v50 }
 0x786   : > { %2247 = vmatmul.bf16.vlgmr.msrb.gmra.mxu1 %v1939_v46  ;;  %v1932_v49 = vmul.f32 %v1928_v27, %v1764_v36 }
 0x787   : > { %v1886_v53 = vadd.f32 %v3304_v20, %v1885_v55 }
 0x788   : > { %v1936_v44 = vpack.c.bf16 %v1932_v49, %v1932_v49 }
 0x789   : > { %v1890_v57 = vsel %vm1889_vm12, %v3304_v20, %v1886_v53 }
 0x78a   : > { %2208 = vmatmul.bf16.vlgmr.msra.gmra.mxu2 %v1936_v44  ;;  %v1895_v41 = vsel %vm1892_vm13, %v1894_v54, %v1890_v57 }
 0x78b   : > { %v1925_v58 = vmul.f32 %v1895_v41, %v1833_v0 }
 0x78d   : > { %v1929_v60 = vadd.f32 1.0, %v1925_v58 }
 0x78f   : > { %v1933_v61 = vmul.f32 %v1929_v60, %v1765_v59 }
 0x791   : > { %v1937_v62 = vpack.c.bf16 %v1933_v61, %v1933_v61 }
 0x793   : > { %2221 = vmatmul.bf16.vlgmr.msrb.gmra.mxu3 %v1937_v62 }
 0x802   : > { %v2235_v2 = vpop.f32.mrf.mxu0 }
 0x803   : > { %v2248_v3 = vpop.f32.mrf.mxu1 }
 0x80a   : > { %v2237_v4 = vpop.f32.mrf.mxu0 }
 0x80b   : > { %v2250_v6 = vpop.f32.mrf.mxu1 }
 0x80d   : > { %v2209_v8 = vpop.f32.mrf.mxu2 }
 0x80e   : > { %v2210_v11 = vadd.f32 %v3274_v9, %v2209_v8 }
 0x815   : > { %v2211_v10 = vpop.f32.mrf.mxu2 }
 0x816   : > { %v2222_v56 = vpop.f32.mrf.mxu3 }
 0x817   : > { %v2223_v12 = vadd.f32 %v2222_v56, %v2210_v11 }
 0x819   : > { %v2236_v13 = vadd.f32 %v2235_v2, %v2223_v12 }
 0x81b   : > { %v2249_v5 = vadd.f32 %v2248_v3, %v2236_v13  ;;  %2257 = sbr.rel (%p3005_p11) target bundleno = 2347 (0x92b), region = 124 }
 0x81d   : > { %v2252_v14 = vadd.f32 %v2249_v5, %v4286_v29 }
 0x81e   : > { %v2224_v42 = vpop.f32.mrf.mxu3 }
 0x81f   : > { %2253 = vst [vmem:[#allocation2] sm:$0xff] %v2252_v14 }
 0x820   : > { %2260 = vadd.xlane.f32.xlu0 %v2252_v14  ;;  %v3305_v26 = vld [vmem:[%s4683_s7] ss:$0 sm:$0xff] }
 0x893   : > { %v2261_v15 = vpop.xlane.xlu0 %2260 }
 0x894   : > { %v2262_v16 = vmul.f32 %v2261_v15, %v4164_v17 }
 0x896   : > { %v2263_v18 = vsub.f32 %v2252_v14, %v2262_v16 }
 0x898   : > { %v2264_v19 = vmul.f32 %v2263_v18, %v2263_v18 }
 0x89a   : > { %2265 = vadd.xlane.f32.xlu0 %v2264_v19 }
 0x90d   : > { %v2266_v38 = vpop.xlane.xlu0 %2265 }
 0x90e   : > { %v2267_v21 = vmul.f32 %v2266_v38, %v4164_v17  ;;  %v3306_v17 = vld [vmem:[%s4684_s27] ss:$0 sm:$0xff] }
 0x910   : > { %v2268_v22 = vadd.f32 1e-05, %v2267_v21 }
 0x912   : > { %3307 = vrsqrt.f32 %v2268_v22  ;;  %vm2275_vm15 = vweird.f32 %v2268_v22 }
 0x918   : > { %v3308_v7 = vpop.eup %3307 }
 0x919   : > { %v2270_v29 = vmul.f32 %v3308_v7, %v2268_v22  ;;  %vm2276_vm14 = vweird.f32 %v3308_v7 }
 0x91a   : > { %vm2277_vm0 = vmor %vm2275_vm15, %vm2276_vm14 }
 0x91b   : > { %v2271_v63 = vmul.f32 %v3308_v7, %v2270_v29 }
 0x91d   : > { %v2272_v23 = vmul.f32 0.5, %v2271_v63 }
 0x91f   : > { %v2273_v24 = vsub.f32 1.5, %v2272_v23 }
 0x921   : > { %v2274_v25 = vmul.f32 %v3308_v7, %v2273_v24 }
 0x923   : > { %v2278_v39 = vsel %vm2277_vm0, %v3308_v7, %v2274_v25 }
 0x924   : > { %v2279_v28 = vmul.f32 %v2278_v39, %v2263_v18 }
 0x926   : > { %v2283_v30 = vmul.f32 %v3305_v26, %v2279_v28 }
 0x928   : > { %v2287_v32 = vadd.f32 %v3306_v17, %v2283_v30 }
 0x92a   : > { %2288 = vst [vmem:[%s4151_s0] sm:$0xff] %v2287_v32 }
 0x92b PF: > { %s4685_s28 = sld [smem:[#allocation36_spill]]  ;;  %s2302_s1 = sshll.u32 %s4151_s0, 4  ;;  %s2303_s1 = int_to_ptr.vmem [resolvable:$true] %s2302_s1 }
 0x92c   : > { %s4687_s24 = sld [smem:[#allocation59_spill]]  ;;  %s2290_s18 = scalar_lea.sflag [#allocation9], %s4082_s13 }
 0x931   : > { %s3007_s14 = sshll.u32 %s4685_s28, 3 }
 0x932   : > { %s2300_s20 = scalar_lea.hbm %s4687_s24, %s3007_s14  ;;  %s3629_s16 = scalar_lea.hbm %s4687_s24, 16 }
 0x933   : > { %s2304_s29 = sshll.u32 %s2300_s20, 4  ;;  %s2305_s29 = int_to_ptr.hbm [resolvable:$true] %s2304_s29 }
 0x934   : > { %s3623_s4 = sshra.s32 %s2305_s29, 4  ;;  %s3624_s4 = int_to_ptr.hbm [resolvable:$true] %s3623_s4 }
 0x935   : > { %s3625_s3 = scalar_lea.hbm %s3624_s4, 8  ;;  %p3630_p5 = scmp.lt.s32.totalorder %s3624_s4, %s4687_s24 }
 0x936   : > { %p3626_p12 = scmp.ne.s32.totalorder %s3624_s4, %s3625_s3  ;;  %p3631_p6 = scmp.lt.s32.totalorder %s3629_s16, %s3625_s3 }
 0x938   : > { %p3627_p3 = pnand %p3626_p12, %p4014_p13  ;;  %p3632_p8 = por %p3631_p6, %p3630_p5 }
 0x93a   : > { %p3628_p0 = pneg %p3627_p3 }
 0x93c   : > { %p3633_p9 = pnand %p3632_p8, %p3628_p0 }
 0x93e   : > { %3636 = shalt.err (!%p3633_p9)
}
 0x93f   : > { %3132 = dma.vmem_to_hbm [thread:$0]  (%p4014_p13), %s2303_s1, 128, %s2305_s29, %s2290_s18  }
 0x940 PF: > { %s4688_s13 = sld [smem:[#allocation38_spill]] }
 0x941   : > { %s4689_s0 = sld [smem:[#allocation33_spill]] }
 0x946   : > { %p3170_p2 = scmp.ge.s32.totalorder %s4688_s13, 2 }
 0x947   : > { %s2316_s22 = sand.u32 1, %s4689_s0  }
 0x948   : > { %p3166_p10 = pnand %p3170_p2, %p4023_p1  ;;  %s2317_s9 = scalar_lea.sflag [#allocation9], %s2316_s22 }
 0x94a   : > { %p3167_p4 = pneg %p3166_p10 }
 0x94c   : > { %3706 = dma.done.wait (%p3167_p4), %s2317_s9, 128  }
 0x94d   : > { %3708 = vsyncadd (%p3167_p4), %s2317_s9, 4294967168  ;;  %s45_s23 = sadd.s32 1, %s4688_s13   ;;  %s4691_s10 = sld [smem:[#allocation32_spill]] }
 0x94e   : > { %p42_p7 = scmp.ge.s32.totalorder %s45_s23, 6   ;;  %s4692_s15 = sld [smem:[#allocation41_spill]] }
 0x94f   : > { %s4693_s7 = sld [smem:[#allocation34_spill]]  ;;  %s4698_s29 = smov %s3715_s30 }
 0x950   : > { %s4694_s18 = sld [smem:[#allocation42_spill]]  ;;  %s4700_s16 = smov %s3727_s17 }
 0x951   : > { %s4695_s20 = sld [smem:[#allocation37_spill]]  ;;  %s4702_s19 = smov %s3743_s21 }
 0x952   : > { %s4696_s2 = sld [smem:[#allocation39_spill]] }
 0x953   : > { %s4697_s22 = sld [smem:[#allocation40_spill]]  ;;  %s4699_s30 = smov %s4691_s10 }
 0x954   :  { %44 = sbr.rel (!%p42_p7) target bundleno = 35 (0x23), region = 253 }
 0x955   : > { %s4701_s17 = smov %s4693_s7 }
 0x958   : > { %s4703_s21 = smov %s4696_s2 }
 0x959   :  { %2323 = vsyncpa [#allocation8], 1 }
 0x95a   :  { %2325 = vsyncpa [#allocation8 + $0x1], 1 }
 0x95b   :  { %2326 = vsyncpa [#allocation11], 1 }
 0x95c   :  { %2328 = vsyncpa [#allocation11 + $0x1], 1 }
 0x95d   :  { %2329 = vsyncpa [#allocation14], 1 }
 0x95e   :  { %2331 = vsyncpa [#allocation14 + $0x1], 1 }
 0x95f   :  { %2332 = vsyncpa [#allocation17], 1 }
 0x960   :  { %2334 = vsyncpa [#allocation17 + $0x1], 1 }
 0x961   :  { %2335 = vsyncpa [#allocation20], 1 }
 0x962   :  { %2337 = vsyncpa [#allocation20 + $0x1], 1 }
 0x963   :  { %2338 = vsyncpa [#allocation23], 1 }
 0x964   :  { %2340 = vsyncpa [#allocation23 + $0x1], 1 }
 0x965   :  { %2341 = vsyncpa [#allocation9], 1 }
 0x966   :  { %2343 = vsyncpa [#allocation9 + $0x1], 1 }

</bundles_post_ra>
